<compile_context>
chip_gen: v7x
topology: tpu7x:2x2x1
jax: 0.10.0
libtpu: 0.0.40
codegen_flags: <defaults>
</compile_context>

<pallas_src>
import functools

import jax
import jax.numpy as jnp
import numpy as np
from jax.experimental import pallas as pl
from jax.experimental.pallas import tpu as pltpu

LATENT_DIM = 32
HIDDEN = 256
N_STAGES = 5
W_OUT = 2 ** N_STAGES  # 32


def _round_up(x, m):
    return ((x + m - 1) // m) * m


def decoder_kernel(z_ref, w1_ref, b1_ref, w2_ref, b2_ref, cw_ref, cb_ref,
                   out_ref, bufa_ref, bufb_ref):
    # z_ref: [tb, L]  w1: [L,256]  b1: [1,256]  w2: [256,256]  b2: [1,256]
    # cw_ref: SMEM f32[15] (5 stages x 3 transposed-conv taps)  cb_ref: SMEM f32[5]
    # out_ref: [1, 32, tb, 256]  (one contiguous output slab per grid step)
    # bufa_ref: VMEM [8, tb, 256], bufb_ref: VMEM [16, tb, 256]  (ping-pong stage buffers)

    # ---- MLP head (MXU matmuls, f32 accumulation) ----
    h = jnp.dot(z_ref[...], w1_ref[...], preferred_element_type=jnp.float32) + b1_ref[...]
    h = jnp.maximum(h, 0.0)
    h = jnp.dot(h, w2_ref[...], preferred_element_type=jnp.float32) + b2_ref[...]
    h = jnp.maximum(h, 0.0)                       # [tb, 256], width-1 input to stage 0

    # ---- transposed-conv stages along width (k=3, stride=2, pad=1, out_pad=1) ----
    # For input width Win the output width is 2*Win with
    #   out[2j]   = x[j]*w[1]                            + bias
    #   out[2j+1] = x[j]*w[2] + x[j+1]*w[0] (if j+1<Win) + bias
    # Each output width-position is one fused FMA + activation + store of a [tb,256] tile.
    def run_stage(s, win, read, write):
        tap0 = cw_ref[3 * s + 0]
        tap1 = cw_ref[3 * s + 1]
        tap2 = cw_ref[3 * s + 2]
        bias = cb_ref[s]
        last = s == N_STAGES - 1

        def act(v):
            return jnp.tanh(v) if last else jnp.maximum(v, 0.0)

        for j in range(win):
            xj = read(j)
            write(2 * j, act(xj * tap1 + bias))
            odd = xj * tap2 + bias
            if j + 1 < win:
                odd = odd + read(j + 1) * tap0
            write(2 * j + 1, act(odd))

    def read_a(j):
        return bufa_ref[j]

    def read_b(j):
        return bufb_ref[j]

    def write_a(w, v):
        bufa_ref[w] = v

    def write_b(w, v):
        bufb_ref[w] = v

    def write_out(w, v):
        out_ref[0, w] = v

    run_stage(0, 1, lambda j: h, write_a)   # width  1 ->  2  (bufa[0:2])
    run_stage(1, 2, read_a, write_b)        # width  2 ->  4  (bufb[0:4])
    run_stage(2, 4, read_b, write_a)        # width  4 ->  8  (bufa[0:8])
    run_stage(3, 8, read_a, write_b)        # width  8 -> 16  (bufb[0:16])
    run_stage(4, 16, read_b, write_out)     # width 16 -> 32  (out_ref, tanh fused)


@functools.partial(jax.jit, static_argnames=("block_b",))
def decoder_forward(z, params, block_b=128):
    w1, b1, w2, b2, cw, cb = params
    B, L = z.shape
    cw_flat = cw.reshape(-1).astype(jnp.float32)   # flat 1D SMEM (no [8,128] padding)
    cb_flat = cb.reshape(-1).astype(jnp.float32)

    # Batch tiling: multiple of 8, default 128 (fills MXU M-dim, amortizes step overhead),
    # rebalanced to minimize padding, and >= 2 grid steps when batch allows (v7x: 2 TCs).
    b8 = _round_up(B, 8)
    tb = min(_round_up(block_b, 8), b8)
    nsteps = -(-b8 // tb)
    if b8 > 8 and nsteps < 2:
        nsteps = 2
    tb = _round_up(-(-b8 // nsteps), 8)
    Bp = tb * nsteps
    if Bp != B:
        z = jnp.pad(z, ((0, Bp - B), (0, 0)))

    flops = 2 * Bp * HIDDEN * (L + HIDDEN) + 6 * Bp * HIDDEN * (2 * W_OUT - 2)
    transcendentals = Bp * HIDDEN * W_OUT
    bytes_accessed = 4 * (Bp * L + L * HIDDEN + HIDDEN * HIDDEN + 2 * HIDDEN + 20
                          + W_OUT * Bp * HIDDEN)

    out = pl.pallas_call(
        decoder_kernel,
        out_shape=jax.ShapeDtypeStruct((nsteps, W_OUT, tb, HIDDEN), jnp.float32),
        grid=(nsteps,),
        in_specs=[
            pl.BlockSpec((tb, L), lambda i: (i, 0)),
            pl.BlockSpec((L, HIDDEN), lambda i: (0, 0)),
            pl.BlockSpec((1, HIDDEN), lambda i: (0, 0)),
            pl.BlockSpec((HIDDEN, HIDDEN), lambda i: (0, 0)),
            pl.BlockSpec((1, HIDDEN), lambda i: (0, 0)),
            pl.BlockSpec(memory_space=pltpu.MemorySpace.SMEM),
            pl.BlockSpec(memory_space=pltpu.MemorySpace.SMEM),
        ],
        out_specs=pl.BlockSpec((1, W_OUT, tb, HIDDEN), lambda i: (i, 0, 0, 0)),
        scratch_shapes=[
            pltpu.VMEM((8, tb, HIDDEN), jnp.float32),
            pltpu.VMEM((16, tb, HIDDEN), jnp.float32),
        ],
        compiler_params=pltpu.CompilerParams(
            dimension_semantics=("parallel",),
            vmem_limit_bytes=48 * 1024 * 1024,
        ),
        cost_estimate=pl.CostEstimate(
            flops=flops, transcendentals=transcendentals, bytes_accessed=bytes_accessed),
    )(z, w1, b1, w2, b2, cw_flat, cb_flat)

    # [nsteps, 32, tb, 256] -> NCHW [B, 1, 256, 32] (matches PyTorch output).
    # TODO(synk): let downstream consumers take the kernel's width-major slab directly and
    # drop this transpose — it re-reads/re-writes all output HBM bytes of an
    # HBM-writeback-bound kernel.
    out = jnp.transpose(out, (0, 2, 3, 1)).reshape(Bp, HIDDEN, W_OUT)
    return out[:B, None, :, :]


def reference_forward(z, params):
    """Pure-JAX reference matching PyTorch semantics exactly."""
    w1, b1, w2, b2, cw, cb = params
    hi = jax.lax.Precision.HIGHEST
    h = jax.nn.relu(jnp.dot(z, w1, precision=hi) + b1)
    h = jax.nn.relu(jnp.dot(h, w2, precision=hi) + b2)
    x = h[:, None, :, None]  # Unflatten(1, (1, 256, 1)) -> NCHW [B,1,256,1]
    for s in range(N_STAGES):
        B_, C, H, Win = x.shape
        Wout = 2 * Win  # (Win-1)*2 - 2*1 + 3 + 1
        out = jnp.zeros((B_, C, H, Wout), jnp.float32)
        for i in range(Win):
            for k in range(3):
                o = 2 * i - 1 + k  # o = i*stride - pad + k
                if 0 <= o < Wout:
                    out = out.at[:, :, :, o].add(x[:, :, :, i] * cw[s, k])
        out = out + cb[s]
        x = jax.nn.relu(out) if s < N_STAGES - 1 else jnp.tanh(out)
    return x


def init_params(key):
    k1, k2, k3, k4, k5, k6 = jax.random.split(key, 6)

    def u(k, shape, fan_in):
        bound = 1.0 / np.sqrt(fan_in)
        return jax.random.uniform(k, shape, jnp.float32, -bound, bound)

    w1 = u(k1, (LATENT_DIM, HIDDEN), LATENT_DIM)   # stored as [in, out]
    b1 = u(k2, (1, HIDDEN), LATENT_DIM)
    w2 = u(k3, (HIDDEN, HIDDEN), HIDDEN)
    b2 = u(k4, (1, HIDDEN), HIDDEN)
    cw = u(k5, (N_STAGES, 3), 3)                   # 3-tap transposed-conv weights
    cb = u(k6, (N_STAGES,), 3)                     # per-stage conv bias
    return w1, b1, w2, b2, cw, cb


if __name__ == "__main__":
    key = jax.random.PRNGKey(0)
    kz, kz2, kp = jax.random.split(key, 3)
    params = init_params(kp)

    # Small-batch check (B=2, single grid step, padded batch tile).
    B = 2
    z = jax.random.normal(kz, (B, LATENT_DIM), jnp.float32)
    out = jax.block_until_ready(decoder_forward(z, params))
    assert out.shape == (B, 1, 256, 32), out.shape
    ref = jax.block_until_ready(reference_forward(z, params))
    np.testing.assert_allclose(np.asarray(out), np.asarray(ref), rtol=5e-5, atol=5e-5)

    # Multi-step-grid check (B=35 -> 2 parallel grid steps, padded remainder sliced away).
    B2 = 35
    z2 = jax.random.normal(kz2, (B2, LATENT_DIM), jnp.float32)
    out2 = jax.block_until_ready(decoder_forward(z2, params))
    assert out2.shape == (B2, 1, 256, 32), out2.shape
    ref2 = jax.block_until_ready(reference_forward(z2, params))
    np.testing.assert_allclose(np.asarray(out2), np.asarray(ref2), rtol=5e-5, atol=5e-5)

    print("KERNEL_OK")
</pallas_src>

<mosaic_0001>
module attributes {stable_mosaic.version = 11 : i64} {
  func.func @decoder_kernel(%arg0: i32, %arg1: memref<8x32xf32, #tpu.memory_space<vmem>>, %arg2: memref<32x256xf32, #tpu.memory_space<vmem>>, %arg3: memref<1x256xf32, #tpu.memory_space<vmem>>, %arg4: memref<256x256xf32, #tpu.memory_space<vmem>>, %arg5: memref<1x256xf32, #tpu.memory_space<vmem>>, %arg6: memref<15xf32, #tpu.memory_space<smem>>, %arg7: memref<5xf32, #tpu.memory_space<smem>>, %arg8: memref<1x32x8x256xf32, #tpu.memory_space<vmem>>, %arg9: memref<8x8x256xf32, #tpu.memory_space<vmem>>, %arg10: memref<16x8x256xf32, #tpu.memory_space<vmem>>) attributes {dimension_semantics = [#tpu.dimension_semantics<parallel>], iteration_bounds = array<i64: 1>, scalar_prefetch = 0 : i64, scratch_operands = 2 : i64, tpu.core_type = #tpu.core_type<tc>, window_params = [{transform_indices = @transform_0, window_bounds = array<i64: 8, 32>}, {pipeline_mode = #tpu.pipeline_mode<synchronous>, transform_indices = @transform_1, window_bounds = array<i64: 32, 256>}, {pipeline_mode = #tpu.pipeline_mode<synchronous>, transform_indices = @transform_2, window_bounds = array<i64: 1, 256>}, {pipeline_mode = #tpu.pipeline_mode<synchronous>, transform_indices = @transform_3, window_bounds = array<i64: 256, 256>}, {pipeline_mode = #tpu.pipeline_mode<synchronous>, transform_indices = @transform_4, window_bounds = array<i64: 1, 256>}, {transform_indices = @transform_5, window_bounds = array<i64: 15>}, {transform_indices = @transform_6, window_bounds = array<i64: 5>}, {transform_indices = @transform_7, window_bounds = array<i64: 1, 32, 8, 256>}]} {
    %c0 = arith.constant 0 : index
    %c0_0 = arith.constant 0 : index
    %0 = vector.load %arg1[%c0, %c0_0] : memref<8x32xf32, #tpu.memory_space<vmem>>, vector<8x32xf32>
    %c0_1 = arith.constant 0 : index
    %c0_2 = arith.constant 0 : index
    %1 = vector.load %arg2[%c0_1, %c0_2] : memref<32x256xf32, #tpu.memory_space<vmem>>, vector<32x256xf32>
    %cst = arith.constant dense<0.000000e+00> : vector<8x256xf32>
    %2 = tpu.matmul %0, %1, %cst {dimension_numbers = #tpu.dot_dimension_numbers<[1], [0], [0], [1], [0, 0, 1, 1], [], []>} : vector<8x32xf32>, vector<32x256xf32>, vector<8x256xf32> -> vector<8x256xf32>
    %c0_3 = arith.constant 0 : index
    %c0_4 = arith.constant 0 : index
    %3 = vector.load %arg3[%c0_3, %c0_4] : memref<1x256xf32, #tpu.memory_space<vmem>>, vector<1x256xf32>
    %4 = vector.broadcast %3 : vector<1x256xf32> to vector<8x256xf32>
    %5 = arith.addf %2, %4 : vector<8x256xf32>
    %cst_5 = arith.constant 0.000000e+00 : f32
    %6 = vector.broadcast %cst_5 : f32 to vector<8x256xf32>
    %7 = arith.maximumf %5, %6 : vector<8x256xf32>
    %c0_6 = arith.constant 0 : index
    %c0_7 = arith.constant 0 : index
    %8 = vector.load %arg4[%c0_6, %c0_7] : memref<256x256xf32, #tpu.memory_space<vmem>>, vector<256x256xf32>
    %cst_8 = arith.constant dense<0.000000e+00> : vector<8x256xf32>
    %9 = tpu.matmul %7, %8, %cst_8 {dimension_numbers = #tpu.dot_dimension_numbers<[1], [0], [0], [1], [0, 0, 1, 1], [], []>} : vector<8x256xf32>, vector<256x256xf32>, vector<8x256xf32> -> vector<8x256xf32>
    %c0_9 = arith.constant 0 : index
    %c0_10 = arith.constant 0 : index
    %10 = vector.load %arg5[%c0_9, %c0_10] : memref<1x256xf32, #tpu.memory_space<vmem>>, vector<1x256xf32>
    %11 = vector.broadcast %10 : vector<1x256xf32> to vector<8x256xf32>
    %12 = arith.addf %9, %11 : vector<8x256xf32>
    %cst_11 = arith.constant 0.000000e+00 : f32
    %13 = vector.broadcast %cst_11 : f32 to vector<8x256xf32>
    %14 = arith.maximumf %12, %13 : vector<8x256xf32>
    %c1 = arith.constant 1 : index
    %15 = memref.load %arg6[%c1] : memref<15xf32, #tpu.memory_space<smem>>
    %c2 = arith.constant 2 : index
    %16 = memref.load %arg6[%c2] : memref<15xf32, #tpu.memory_space<smem>>
    %c0_12 = arith.constant 0 : index
    %17 = memref.load %arg7[%c0_12] : memref<5xf32, #tpu.memory_space<smem>>
    %18 = vector.broadcast %15 : f32 to vector<8x256xf32>
    %19 = arith.mulf %14, %18 : vector<8x256xf32>
    %20 = vector.broadcast %17 : f32 to vector<8x256xf32>
    %21 = arith.addf %19, %20 : vector<8x256xf32>
    %cst_13 = arith.constant 0.000000e+00 : f32
    %22 = vector.broadcast %cst_13 : f32 to vector<8x256xf32>
    %23 = arith.maximumf %21, %22 : vector<8x256xf32>
    %c0_14 = arith.constant 0 : index
    %c0_15 = arith.constant 0 : index
    %c0_16 = arith.constant 0 : index
    %24 = vector.load %arg9[%c0_14, %c0_15, %c0_16] : memref<8x8x256xf32, #tpu.memory_space<vmem>>, vector<1x8x256xf32>
    %25 = vector.shape_cast %24 : vector<1x8x256xf32> to vector<8x256xf32>
    %26 = vector.shape_cast %23 : vector<8x256xf32> to vector<1x8x256xf32>
    tpu.vector_store %arg9[%c0_14, %c0_15, %c0_16], %26 {strides = array<i32>} : memref<8x8x256xf32, #tpu.memory_space<vmem>>, vector<1x8x256xf32>,
    %27 = vector.broadcast %16 : f32 to vector<8x256xf32>
    %28 = arith.mulf %14, %27 : vector<8x256xf32>
    %29 = vector.broadcast %17 : f32 to vector<8x256xf32>
    %30 = arith.addf %28, %29 : vector<8x256xf32>
    %cst_17 = arith.constant 0.000000e+00 : f32
    %31 = vector.broadcast %cst_17 : f32 to vector<8x256xf32>
    %32 = arith.maximumf %30, %31 : vector<8x256xf32>
    %c1_18 = arith.constant 1 : index
    %c0_19 = arith.constant 0 : index
    %c0_20 = arith.constant 0 : index
    %33 = vector.load %arg9[%c1_18, %c0_19, %c0_20] : memref<8x8x256xf32, #tpu.memory_space<vmem>>, vector<1x8x256xf32>
    %34 = vector.shape_cast %33 : vector<1x8x256xf32> to vector<8x256xf32>
    %35 = vector.shape_cast %32 : vector<8x256xf32> to vector<1x8x256xf32>
    tpu.vector_store %arg9[%c1_18, %c0_19, %c0_20], %35 {strides = array<i32>} : memref<8x8x256xf32, #tpu.memory_space<vmem>>, vector<1x8x256xf32>,
    %c3 = arith.constant 3 : index
    %36 = memref.load %arg6[%c3] : memref<15xf32, #tpu.memory_space<smem>>
    %c4 = arith.constant 4 : index
    %37 = memref.load %arg6[%c4] : memref<15xf32, #tpu.memory_space<smem>>
    %c5 = arith.constant 5 : index
    %38 = memref.load %arg6[%c5] : memref<15xf32, #tpu.memory_space<smem>>
    %c1_21 = arith.constant 1 : index
    %39 = memref.load %arg7[%c1_21] : memref<5xf32, #tpu.memory_space<smem>>
    %c0_22 = arith.constant 0 : index
    %c0_23 = arith.constant 0 : index
    %c0_24 = arith.constant 0 : index
    %40 = vector.load %arg9[%c0_22, %c0_23, %c0_24] : memref<8x8x256xf32, #tpu.memory_space<vmem>>, vector<1x8x256xf32>
    %41 = vector.shape_cast %40 : vector<1x8x256xf32> to vector<8x256xf32>
    %42 = vector.broadcast %37 : f32 to vector<8x256xf32>
    %43 = arith.mulf %41, %42 : vector<8x256xf32>
    %44 = vector.broadcast %39 : f32 to vector<8x256xf32>
    %45 = arith.addf %43, %44 : vector<8x256xf32>
    %cst_25 = arith.constant 0.000000e+00 : f32
    %46 = vector.broadcast %cst_25 : f32 to vector<8x256xf32>
    %47 = arith.maximumf %45, %46 : vector<8x256xf32>
    %c0_26 = arith.constant 0 : index
    %c0_27 = arith.constant 0 : index
    %c0_28 = arith.constant 0 : index
    %48 = vector.load %arg10[%c0_26, %c0_27, %c0_28] : memref<16x8x256xf32, #tpu.memory_space<vmem>>, vector<1x8x256xf32>
    %49 = vector.shape_cast %48 : vector<1x8x256xf32> to vector<8x256xf32>
    %50 = vector.shape_cast %47 : vector<8x256xf32> to vector<1x8x256xf32>
    tpu.vector_store %arg10[%c0_26, %c0_27, %c0_28], %50 {strides = array<i32>} : memref<16x8x256xf32, #tpu.memory_space<vmem>>, vector<1x8x256xf32>,
    %51 = vector.broadcast %38 : f32 to vector<8x256xf32>
    %52 = arith.mulf %41, %51 : vector<8x256xf32>
    %53 = vector.broadcast %39 : f32 to vector<8x256xf32>
    %54 = arith.addf %52, %53 : vector<8x256xf32>
    %c1_29 = arith.constant 1 : index
    %c0_30 = arith.constant 0 : index
    %c0_31 = arith.constant 0 : index
    %55 = vector.load %arg9[%c1_29, %c0_30, %c0_31] : memref<8x8x256xf32, #tpu.memory_space<vmem>>, vector<1x8x256xf32>
    %56 = vector.shape_cast %55 : vector<1x8x256xf32> to vector<8x256xf32>
    %57 = vector.broadcast %36 : f32 to vector<8x256xf32>
    %58 = arith.mulf %56, %57 : vector<8x256xf32>
    %59 = arith.addf %54, %58 : vector<8x256xf32>
    %cst_32 = arith.constant 0.000000e+00 : f32
    %60 = vector.broadcast %cst_32 : f32 to vector<8x256xf32>
    %61 = arith.maximumf %59, %60 : vector<8x256xf32>
    %c1_33 = arith.constant 1 : index
    %c0_34 = arith.constant 0 : index
    %c0_35 = arith.constant 0 : index
    %62 = vector.load %arg10[%c1_33, %c0_34, %c0_35] : memref<16x8x256xf32, #tpu.memory_space<vmem>>, vector<1x8x256xf32>
    %63 = vector.shape_cast %62 : vector<1x8x256xf32> to vector<8x256xf32>
    %64 = vector.shape_cast %61 : vector<8x256xf32> to vector<1x8x256xf32>
    tpu.vector_store %arg10[%c1_33, %c0_34, %c0_35], %64 {strides = array<i32>} : memref<16x8x256xf32, #tpu.memory_space<vmem>>, vector<1x8x256xf32>,
    %c1_36 = arith.constant 1 : index
    %c0_37 = arith.constant 0 : index
    %c0_38 = arith.constant 0 : index
    %65 = vector.load %arg9[%c1_36, %c0_37, %c0_38] : memref<8x8x256xf32, #tpu.memory_space<vmem>>, vector<1x8x256xf32>
    %66 = vector.shape_cast %65 : vector<1x8x256xf32> to vector<8x256xf32>
    %67 = vector.broadcast %37 : f32 to vector<8x256xf32>
    %68 = arith.mulf %66, %67 : vector<8x256xf32>
    %69 = vector.broadcast %39 : f32 to vector<8x256xf32>
    %70 = arith.addf %68, %69 : vector<8x256xf32>
    %cst_39 = arith.constant 0.000000e+00 : f32
    %71 = vector.broadcast %cst_39 : f32 to vector<8x256xf32>
    %72 = arith.maximumf %70, %71 : vector<8x256xf32>
    %c2_40 = arith.constant 2 : index
    %c0_41 = arith.constant 0 : index
    %c0_42 = arith.constant 0 : index
    %73 = vector.load %arg10[%c2_40, %c0_41, %c0_42] : memref<16x8x256xf32, #tpu.memory_space<vmem>>, vector<1x8x256xf32>
    %74 = vector.shape_cast %73 : vector<1x8x256xf32> to vector<8x256xf32>
    %75 = vector.shape_cast %72 : vector<8x256xf32> to vector<1x8x256xf32>
    tpu.vector_store %arg10[%c2_40, %c0_41, %c0_42], %75 {strides = array<i32>} : memref<16x8x256xf32, #tpu.memory_space<vmem>>, vector<1x8x256xf32>,
    %76 = vector.broadcast %38 : f32 to vector<8x256xf32>
    %77 = arith.mulf %66, %76 : vector<8x256xf32>
    %78 = vector.broadcast %39 : f32 to vector<8x256xf32>
    %79 = arith.addf %77, %78 : vector<8x256xf32>
    %cst_43 = arith.constant 0.000000e+00 : f32
    %80 = vector.broadcast %cst_43 : f32 to vector<8x256xf32>
    %81 = arith.maximumf %79, %80 : vector<8x256xf32>
    %c3_44 = arith.constant 3 : index
    %c0_45 = arith.constant 0 : index
    %c0_46 = arith.constant 0 : index
    %82 = vector.load %arg10[%c3_44, %c0_45, %c0_46] : memref<16x8x256xf32, #tpu.memory_space<vmem>>, vector<1x8x256xf32>
    %83 = vector.shape_cast %82 : vector<1x8x256xf32> to vector<8x256xf32>
    %84 = vector.shape_cast %81 : vector<8x256xf32> to vector<1x8x256xf32>
    tpu.vector_store %arg10[%c3_44, %c0_45, %c0_46], %84 {strides = array<i32>} : memref<16x8x256xf32, #tpu.memory_space<vmem>>, vector<1x8x256xf32>,
    %c6 = arith.constant 6 : index
    %85 = memref.load %arg6[%c6] : memref<15xf32, #tpu.memory_space<smem>>
    %c7 = arith.constant 7 : index
    %86 = memref.load %arg6[%c7] : memref<15xf32, #tpu.memory_space<smem>>
    %c8 = arith.constant 8 : index
    %87 = memref.load %arg6[%c8] : memref<15xf32, #tpu.memory_space<smem>>
    %c2_47 = arith.constant 2 : index
    %88 = memref.load %arg7[%c2_47] : memref<5xf32, #tpu.memory_space<smem>>
    %c0_48 = arith.constant 0 : index
    %c0_49 = arith.constant 0 : index
    %c0_50 = arith.constant 0 : index
    %89 = vector.load %arg10[%c0_48, %c0_49, %c0_50] : memref<16x8x256xf32, #tpu.memory_space<vmem>>, vector<1x8x256xf32>
    %90 = vector.shape_cast %89 : vector<1x8x256xf32> to vector<8x256xf32>
    %91 = vector.broadcast %86 : f32 to vector<8x256xf32>
    %92 = arith.mulf %90, %91 : vector<8x256xf32>
    %93 = vector.broadcast %88 : f32 to vector<8x256xf32>
    %94 = arith.addf %92, %93 : vector<8x256xf32>
    %cst_51 = arith.constant 0.000000e+00 : f32
    %95 = vector.broadcast %cst_51 : f32 to vector<8x256xf32>
    %96 = arith.maximumf %94, %95 : vector<8x256xf32>
    %c0_52 = arith.constant 0 : index
    %c0_53 = arith.constant 0 : index
    %c0_54 = arith.constant 0 : index
    %97 = vector.load %arg9[%c0_52, %c0_53, %c0_54] : memref<8x8x256xf32, #tpu.memory_space<vmem>>, vector<1x8x256xf32>
    %98 = vector.shape_cast %97 : vector<1x8x256xf32> to vector<8x256xf32>
    %99 = vector.shape_cast %96 : vector<8x256xf32> to vector<1x8x256xf32>
    tpu.vector_store %arg9[%c0_52, %c0_53, %c0_54], %99 {strides = array<i32>} : memref<8x8x256xf32, #tpu.memory_space<vmem>>, vector<1x8x256xf32>,
    %100 = vector.broadcast %87 : f32 to vector<8x256xf32>
    %101 = arith.mulf %90, %100 : vector<8x256xf32>
    %102 = vector.broadcast %88 : f32 to vector<8x256xf32>
    %103 = arith.addf %101, %102 : vector<8x256xf32>
    %c1_55 = arith.constant 1 : index
    %c0_56 = arith.constant 0 : index
    %c0_57 = arith.constant 0 : index
    %104 = vector.load %arg10[%c1_55, %c0_56, %c0_57] : memref<16x8x256xf32, #tpu.memory_space<vmem>>, vector<1x8x256xf32>
    %105 = vector.shape_cast %104 : vector<1x8x256xf32> to vector<8x256xf32>
    %106 = vector.broadcast %85 : f32 to vector<8x256xf32>
    %107 = arith.mulf %105, %106 : vector<8x256xf32>
    %108 = arith.addf %103, %107 : vector<8x256xf32>
    %cst_58 = arith.constant 0.000000e+00 : f32
    %109 = vector.broadcast %cst_58 : f32 to vector<8x256xf32>
    %110 = arith.maximumf %108, %109 : vector<8x256xf32>
    %c1_59 = arith.constant 1 : index
    %c0_60 = arith.constant 0 : index
    %c0_61 = arith.constant 0 : index
    %111 = vector.load %arg9[%c1_59, %c0_60, %c0_61] : memref<8x8x256xf32, #tpu.memory_space<vmem>>, vector<1x8x256xf32>
    %112 = vector.shape_cast %111 : vector<1x8x256xf32> to vector<8x256xf32>
    %113 = vector.shape_cast %110 : vector<8x256xf32> to vector<1x8x256xf32>
    tpu.vector_store %arg9[%c1_59, %c0_60, %c0_61], %113 {strides = array<i32>} : memref<8x8x256xf32, #tpu.memory_space<vmem>>, vector<1x8x256xf32>,
    %c1_62 = arith.constant 1 : index
    %c0_63 = arith.constant 0 : index
    %c0_64 = arith.constant 0 : index
    %114 = vector.load %arg10[%c1_62, %c0_63, %c0_64] : memref<16x8x256xf32, #tpu.memory_space<vmem>>, vector<1x8x256xf32>
    %115 = vector.shape_cast %114 : vector<1x8x256xf32> to vector<8x256xf32>
    %116 = vector.broadcast %86 : f32 to vector<8x256xf32>
    %117 = arith.mulf %115, %116 : vector<8x256xf32>
    %118 = vector.broadcast %88 : f32 to vector<8x256xf32>
    %119 = arith.addf %117, %118 : vector<8x256xf32>
    %cst_65 = arith.constant 0.000000e+00 : f32
    %120 = vector.broadcast %cst_65 : f32 to vector<8x256xf32>
    %121 = arith.maximumf %119, %120 : vector<8x256xf32>
    %c2_66 = arith.constant 2 : index
    %c0_67 = arith.constant 0 : index
    %c0_68 = arith.constant 0 : index
    %122 = vector.load %arg9[%c2_66, %c0_67, %c0_68] : memref<8x8x256xf32, #tpu.memory_space<vmem>>, vector<1x8x256xf32>
    %123 = vector.shape_cast %122 : vector<1x8x256xf32> to vector<8x256xf32>
    %124 = vector.shape_cast %121 : vector<8x256xf32> to vector<1x8x256xf32>
    tpu.vector_store %arg9[%c2_66, %c0_67, %c0_68], %124 {strides = array<i32>} : memref<8x8x256xf32, #tpu.memory_space<vmem>>, vector<1x8x256xf32>,
    %125 = vector.broadcast %87 : f32 to vector<8x256xf32>
    %126 = arith.mulf %115, %125 : vector<8x256xf32>
    %127 = vector.broadcast %88 : f32 to vector<8x256xf32>
    %128 = arith.addf %126, %127 : vector<8x256xf32>
    %c2_69 = arith.constant 2 : index
    %c0_70 = arith.constant 0 : index
    %c0_71 = arith.constant 0 : index
    %129 = vector.load %arg10[%c2_69, %c0_70, %c0_71] : memref<16x8x256xf32, #tpu.memory_space<vmem>>, vector<1x8x256xf32>
    %130 = vector.shape_cast %129 : vector<1x8x256xf32> to vector<8x256xf32>
    %131 = vector.broadcast %85 : f32 to vector<8x256xf32>
    %132 = arith.mulf %130, %131 : vector<8x256xf32>
    %133 = arith.addf %128, %132 : vector<8x256xf32>
    %cst_72 = arith.constant 0.000000e+00 : f32
    %134 = vector.broadcast %cst_72 : f32 to vector<8x256xf32>
    %135 = arith.maximumf %133, %134 : vector<8x256xf32>
    %c3_73 = arith.constant 3 : index
    %c0_74 = arith.constant 0 : index
    %c0_75 = arith.constant 0 : index
    %136 = vector.load %arg9[%c3_73, %c0_74, %c0_75] : memref<8x8x256xf32, #tpu.memory_space<vmem>>, vector<1x8x256xf32>
    %137 = vector.shape_cast %136 : vector<1x8x256xf32> to vector<8x256xf32>
    %138 = vector.shape_cast %135 : vector<8x256xf32> to vector<1x8x256xf32>
    tpu.vector_store %arg9[%c3_73, %c0_74, %c0_75], %138 {strides = array<i32>} : memref<8x8x256xf32, #tpu.memory_space<vmem>>, vector<1x8x256xf32>,
    %c2_76 = arith.constant 2 : index
    %c0_77 = arith.constant 0 : index
    %c0_78 = arith.constant 0 : index
    %139 = vector.load %arg10[%c2_76, %c0_77, %c0_78] : memref<16x8x256xf32, #tpu.memory_space<vmem>>, vector<1x8x256xf32>
    %140 = vector.shape_cast %139 : vector<1x8x256xf32> to vector<8x256xf32>
    %141 = vector.broadcast %86 : f32 to vector<8x256xf32>
    %142 = arith.mulf %140, %141 : vector<8x256xf32>
    %143 = vector.broadcast %88 : f32 to vector<8x256xf32>
    %144 = arith.addf %142, %143 : vector<8x256xf32>
    %cst_79 = arith.constant 0.000000e+00 : f32
    %145 = vector.broadcast %cst_79 : f32 to vector<8x256xf32>
    %146 = arith.maximumf %144, %145 : vector<8x256xf32>
    %c4_80 = arith.constant 4 : index
    %c0_81 = arith.constant 0 : index
    %c0_82 = arith.constant 0 : index
    %147 = vector.load %arg9[%c4_80, %c0_81, %c0_82] : memref<8x8x256xf32, #tpu.memory_space<vmem>>, vector<1x8x256xf32>
    %148 = vector.shape_cast %147 : vector<1x8x256xf32> to vector<8x256xf32>
    %149 = vector.shape_cast %146 : vector<8x256xf32> to vector<1x8x256xf32>
    tpu.vector_store %arg9[%c4_80, %c0_81, %c0_82], %149 {strides = array<i32>} : memref<8x8x256xf32, #tpu.memory_space<vmem>>, vector<1x8x256xf32>,
    %150 = vector.broadcast %87 : f32 to vector<8x256xf32>
    %151 = arith.mulf %140, %150 : vector<8x256xf32>
    %152 = vector.broadcast %88 : f32 to vector<8x256xf32>
    %153 = arith.addf %151, %152 : vector<8x256xf32>
    %c3_83 = arith.constant 3 : index
    %c0_84 = arith.constant 0 : index
    %c0_85 = arith.constant 0 : index
    %154 = vector.load %arg10[%c3_83, %c0_84, %c0_85] : memref<16x8x256xf32, #tpu.memory_space<vmem>>, vector<1x8x256xf32>
    %155 = vector.shape_cast %154 : vector<1x8x256xf32> to vector<8x256xf32>
    %156 = vector.broadcast %85 : f32 to vector<8x256xf32>
    %157 = arith.mulf %155, %156 : vector<8x256xf32>
    %158 = arith.addf %153, %157 : vector<8x256xf32>
    %cst_86 = arith.constant 0.000000e+00 : f32
    %159 = vector.broadcast %cst_86 : f32 to vector<8x256xf32>
    %160 = arith.maximumf %158, %159 : vector<8x256xf32>
    %c5_87 = arith.constant 5 : index
    %c0_88 = arith.constant 0 : index
    %c0_89 = arith.constant 0 : index
    %161 = vector.load %arg9[%c5_87, %c0_88, %c0_89] : memref<8x8x256xf32, #tpu.memory_space<vmem>>, vector<1x8x256xf32>
    %162 = vector.shape_cast %161 : vector<1x8x256xf32> to vector<8x256xf32>
    %163 = vector.shape_cast %160 : vector<8x256xf32> to vector<1x8x256xf32>
    tpu.vector_store %arg9[%c5_87, %c0_88, %c0_89], %163 {strides = array<i32>} : memref<8x8x256xf32, #tpu.memory_space<vmem>>, vector<1x8x256xf32>,
    %c3_90 = arith.constant 3 : index
    %c0_91 = arith.constant 0 : index
    %c0_92 = arith.constant 0 : index
    %164 = vector.load %arg10[%c3_90, %c0_91, %c0_92] : memref<16x8x256xf32, #tpu.memory_space<vmem>>, vector<1x8x256xf32>
    %165 = vector.shape_cast %164 : vector<1x8x256xf32> to vector<8x256xf32>
    %166 = vector.broadcast %86 : f32 to vector<8x256xf32>
    %167 = arith.mulf %165, %166 : vector<8x256xf32>
    %168 = vector.broadcast %88 : f32 to vector<8x256xf32>
    %169 = arith.addf %167, %168 : vector<8x256xf32>
    %cst_93 = arith.constant 0.000000e+00 : f32
    %170 = vector.broadcast %cst_93 : f32 to vector<8x256xf32>
    %171 = arith.maximumf %169, %170 : vector<8x256xf32>
    %c6_94 = arith.constant 6 : index
    %c0_95 = arith.constant 0 : index
    %c0_96 = arith.constant 0 : index
    %172 = vector.load %arg9[%c6_94, %c0_95, %c0_96] : memref<8x8x256xf32, #tpu.memory_space<vmem>>, vector<1x8x256xf32>
    %173 = vector.shape_cast %172 : vector<1x8x256xf32> to vector<8x256xf32>
    %174 = vector.shape_cast %171 : vector<8x256xf32> to vector<1x8x256xf32>
    tpu.vector_store %arg9[%c6_94, %c0_95, %c0_96], %174 {strides = array<i32>} : memref<8x8x256xf32, #tpu.memory_space<vmem>>, vector<1x8x256xf32>,
    %175 = vector.broadcast %87 : f32 to vector<8x256xf32>
    %176 = arith.mulf %165, %175 : vector<8x256xf32>
    %177 = vector.broadcast %88 : f32 to vector<8x256xf32>
    %178 = arith.addf %176, %177 : vector<8x256xf32>
    %cst_97 = arith.constant 0.000000e+00 : f32
    %179 = vector.broadcast %cst_97 : f32 to vector<8x256xf32>
    %180 = arith.maximumf %178, %179 : vector<8x256xf32>
    %c7_98 = arith.constant 7 : index
    %c0_99 = arith.constant 0 : index
    %c0_100 = arith.constant 0 : index
    %181 = vector.load %arg9[%c7_98, %c0_99, %c0_100] : memref<8x8x256xf32, #tpu.memory_space<vmem>>, vector<1x8x256xf32>
    %182 = vector.shape_cast %181 : vector<1x8x256xf32> to vector<8x256xf32>
    %183 = vector.shape_cast %180 : vector<8x256xf32> to vector<1x8x256xf32>
    tpu.vector_store %arg9[%c7_98, %c0_99, %c0_100], %183 {strides = array<i32>} : memref<8x8x256xf32, #tpu.memory_space<vmem>>, vector<1x8x256xf32>,
    %c9 = arith.constant 9 : index
    %184 = memref.load %arg6[%c9] : memref<15xf32, #tpu.memory_space<smem>>
    %c10 = arith.constant 10 : index
    %185 = memref.load %arg6[%c10] : memref<15xf32, #tpu.memory_space<smem>>
    %c11 = arith.constant 11 : index
    %186 = memref.load %arg6[%c11] : memref<15xf32, #tpu.memory_space<smem>>
    %c3_101 = arith.constant 3 : index
    %187 = memref.load %arg7[%c3_101] : memref<5xf32, #tpu.memory_space<smem>>
    %c0_102 = arith.constant 0 : index
    %c0_103 = arith.constant 0 : index
    %c0_104 = arith.constant 0 : index
    %188 = vector.load %arg9[%c0_102, %c0_103, %c0_104] : memref<8x8x256xf32, #tpu.memory_space<vmem>>, vector<1x8x256xf32>
    %189 = vector.shape_cast %188 : vector<1x8x256xf32> to vector<8x256xf32>
    %190 = vector.broadcast %185 : f32 to vector<8x256xf32>
    %191 = arith.mulf %189, %190 : vector<8x256xf32>
    %192 = vector.broadcast %187 : f32 to vector<8x256xf32>
    %193 = arith.addf %191, %192 : vector<8x256xf32>
    %cst_105 = arith.constant 0.000000e+00 : f32
    %194 = vector.broadcast %cst_105 : f32 to vector<8x256xf32>
    %195 = arith.maximumf %193, %194 : vector<8x256xf32>
    %c0_106 = arith.constant 0 : index
    %c0_107 = arith.constant 0 : index
    %c0_108 = arith.constant 0 : index
    %196 = vector.load %arg10[%c0_106, %c0_107, %c0_108] : memref<16x8x256xf32, #tpu.memory_space<vmem>>, vector<1x8x256xf32>
    %197 = vector.shape_cast %196 : vector<1x8x256xf32> to vector<8x256xf32>
    %198 = vector.shape_cast %195 : vector<8x256xf32> to vector<1x8x256xf32>
    tpu.vector_store %arg10[%c0_106, %c0_107, %c0_108], %198 {strides = array<i32>} : memref<16x8x256xf32, #tpu.memory_space<vmem>>, vector<1x8x256xf32>,
    %199 = vector.broadcast %186 : f32 to vector<8x256xf32>
    %200 = arith.mulf %189, %199 : vector<8x256xf32>
    %201 = vector.broadcast %187 : f32 to vector<8x256xf32>
    %202 = arith.addf %200, %201 : vector<8x256xf32>
    %c1_109 = arith.constant 1 : index
    %c0_110 = arith.constant 0 : index
    %c0_111 = arith.constant 0 : index
    %203 = vector.load %arg9[%c1_109, %c0_110, %c0_111] : memref<8x8x256xf32, #tpu.memory_space<vmem>>, vector<1x8x256xf32>
    %204 = vector.shape_cast %203 : vector<1x8x256xf32> to vector<8x256xf32>
    %205 = vector.broadcast %184 : f32 to vector<8x256xf32>
    %206 = arith.mulf %204, %205 : vector<8x256xf32>
    %207 = arith.addf %202, %206 : vector<8x256xf32>
    %cst_112 = arith.constant 0.000000e+00 : f32
    %208 = vector.broadcast %cst_112 : f32 to vector<8x256xf32>
    %209 = arith.maximumf %207, %208 : vector<8x256xf32>
    %c1_113 = arith.constant 1 : index
    %c0_114 = arith.constant 0 : index
    %c0_115 = arith.constant 0 : index
    %210 = vector.load %arg10[%c1_113, %c0_114, %c0_115] : memref<16x8x256xf32, #tpu.memory_space<vmem>>, vector<1x8x256xf32>
    %211 = vector.shape_cast %210 : vector<1x8x256xf32> to vector<8x256xf32>
    %212 = vector.shape_cast %209 : vector<8x256xf32> to vector<1x8x256xf32>
    tpu.vector_store %arg10[%c1_113, %c0_114, %c0_115], %212 {strides = array<i32>} : memref<16x8x256xf32, #tpu.memory_space<vmem>>, vector<1x8x256xf32>,
    %c1_116 = arith.constant 1 : index
    %c0_117 = arith.constant 0 : index
    %c0_118 = arith.constant 0 : index
    %213 = vector.load %arg9[%c1_116, %c0_117, %c0_118] : memref<8x8x256xf32, #tpu.memory_space<vmem>>, vector<1x8x256xf32>
    %214 = vector.shape_cast %213 : vector<1x8x256xf32> to vector<8x256xf32>
    %215 = vector.broadcast %185 : f32 to vector<8x256xf32>
    %216 = arith.mulf %214, %215 : vector<8x256xf32>
    %217 = vector.broadcast %187 : f32 to vector<8x256xf32>
    %218 = arith.addf %216, %217 : vector<8x256xf32>
    %cst_119 = arith.constant 0.000000e+00 : f32
    %219 = vector.broadcast %cst_119 : f32 to vector<8x256xf32>
    %220 = arith.maximumf %218, %219 : vector<8x256xf32>
    %c2_120 = arith.constant 2 : index
    %c0_121 = arith.constant 0 : index
    %c0_122 = arith.constant 0 : index
    %221 = vector.load %arg10[%c2_120, %c0_121, %c0_122] : memref<16x8x256xf32, #tpu.memory_space<vmem>>, vector<1x8x256xf32>
    %222 = vector.shape_cast %221 : vector<1x8x256xf32> to vector<8x256xf32>
    %223 = vector.shape_cast %220 : vector<8x256xf32> to vector<1x8x256xf32>
    tpu.vector_store %arg10[%c2_120, %c0_121, %c0_122], %223 {strides = array<i32>} : memref<16x8x256xf32, #tpu.memory_space<vmem>>, vector<1x8x256xf32>,
    %224 = vector.broadcast %186 : f32 to vector<8x256xf32>
    %225 = arith.mulf %214, %224 : vector<8x256xf32>
    %226 = vector.broadcast %187 : f32 to vector<8x256xf32>
    %227 = arith.addf %225, %226 : vector<8x256xf32>
    %c2_123 = arith.constant 2 : index
    %c0_124 = arith.constant 0 : index
    %c0_125 = arith.constant 0 : index
    %228 = vector.load %arg9[%c2_123, %c0_124, %c0_125] : memref<8x8x256xf32, #tpu.memory_space<vmem>>, vector<1x8x256xf32>
    %229 = vector.shape_cast %228 : vector<1x8x256xf32> to vector<8x256xf32>
    %230 = vector.broadcast %184 : f32 to vector<8x256xf32>
    %231 = arith.mulf %229, %230 : vector<8x256xf32>
    %232 = arith.addf %227, %231 : vector<8x256xf32>
    %cst_126 = arith.constant 0.000000e+00 : f32
    %233 = vector.broadcast %cst_126 : f32 to vector<8x256xf32>
    %234 = arith.maximumf %232, %233 : vector<8x256xf32>
    %c3_127 = arith.constant 3 : index
    %c0_128 = arith.constant 0 : index
    %c0_129 = arith.constant 0 : index
    %235 = vector.load %arg10[%c3_127, %c0_128, %c0_129] : memref<16x8x256xf32, #tpu.memory_space<vmem>>, vector<1x8x256xf32>
    %236 = vector.shape_cast %235 : vector<1x8x256xf32> to vector<8x256xf32>
    %237 = vector.shape_cast %234 : vector<8x256xf32> to vector<1x8x256xf32>
    tpu.vector_store %arg10[%c3_127, %c0_128, %c0_129], %237 {strides = array<i32>} : memref<16x8x256xf32, #tpu.memory_space<vmem>>, vector<1x8x256xf32>,
    %c2_130 = arith.constant 2 : index
    %c0_131 = arith.constant 0 : index
    %c0_132 = arith.constant 0 : index
    %238 = vector.load %arg9[%c2_130, %c0_131, %c0_132] : memref<8x8x256xf32, #tpu.memory_space<vmem>>, vector<1x8x256xf32>
    %239 = vector.shape_cast %238 : vector<1x8x256xf32> to vector<8x256xf32>
    %240 = vector.broadcast %185 : f32 to vector<8x256xf32>
    %241 = arith.mulf %239, %240 : vector<8x256xf32>
    %242 = vector.broadcast %187 : f32 to vector<8x256xf32>
    %243 = arith.addf %241, %242 : vector<8x256xf32>
    %cst_133 = arith.constant 0.000000e+00 : f32
    %244 = vector.broadcast %cst_133 : f32 to vector<8x256xf32>
    %245 = arith.maximumf %243, %244 : vector<8x256xf32>
    %c4_134 = arith.constant 4 : index
    %c0_135 = arith.constant 0 : index
    %c0_136 = arith.constant 0 : index
    %246 = vector.load %arg10[%c4_134, %c0_135, %c0_136] : memref<16x8x256xf32, #tpu.memory_space<vmem>>, vector<1x8x256xf32>
    %247 = vector.shape_cast %246 : vector<1x8x256xf32> to vector<8x256xf32>
    %248 = vector.shape_cast %245 : vector<8x256xf32> to vector<1x8x256xf32>
    tpu.vector_store %arg10[%c4_134, %c0_135, %c0_136], %248 {strides = array<i32>} : memref<16x8x256xf32, #tpu.memory_space<vmem>>, vector<1x8x256xf32>,
    %249 = vector.broadcast %186 : f32 to vector<8x256xf32>
    %250 = arith.mulf %239, %249 : vector<8x256xf32>
    %251 = vector.broadcast %187 : f32 to vector<8x256xf32>
    %252 = arith.addf %250, %251 : vector<8x256xf32>
    %c3_137 = arith.constant 3 : index
    %c0_138 = arith.constant 0 : index
    %c0_139 = arith.constant 0 : index
    %253 = vector.load %arg9[%c3_137, %c0_138, %c0_139] : memref<8x8x256xf32, #tpu.memory_space<vmem>>, vector<1x8x256xf32>
    %254 = vector.shape_cast %253 : vector<1x8x256xf32> to vector<8x256xf32>
    %255 = vector.broadcast %184 : f32 to vector<8x256xf32>
    %256 = arith.mulf %254, %255 : vector<8x256xf32>
    %257 = arith.addf %252, %256 : vector<8x256xf32>
    %cst_140 = arith.constant 0.000000e+00 : f32
    %258 = vector.broadcast %cst_140 : f32 to vector<8x256xf32>
    %259 = arith.maximumf %257, %258 : vector<8x256xf32>
    %c5_141 = arith.constant 5 : index
    %c0_142 = arith.constant 0 : index
    %c0_143 = arith.constant 0 : index
    %260 = vector.load %arg10[%c5_141, %c0_142, %c0_143] : memref<16x8x256xf32, #tpu.memory_space<vmem>>, vector<1x8x256xf32>
    %261 = vector.shape_cast %260 : vector<1x8x256xf32> to vector<8x256xf32>
    %262 = vector.shape_cast %259 : vector<8x256xf32> to vector<1x8x256xf32>
    tpu.vector_store %arg10[%c5_141, %c0_142, %c0_143], %262 {strides = array<i32>} : memref<16x8x256xf32, #tpu.memory_space<vmem>>, vector<1x8x256xf32>,
    %c3_144 = arith.constant 3 : index
    %c0_145 = arith.constant 0 : index
    %c0_146 = arith.constant 0 : index
    %263 = vector.load %arg9[%c3_144, %c0_145, %c0_146] : memref<8x8x256xf32, #tpu.memory_space<vmem>>, vector<1x8x256xf32>
    %264 = vector.shape_cast %263 : vector<1x8x256xf32> to vector<8x256xf32>
    %265 = vector.broadcast %185 : f32 to vector<8x256xf32>
    %266 = arith.mulf %264, %265 : vector<8x256xf32>
    %267 = vector.broadcast %187 : f32 to vector<8x256xf32>
    %268 = arith.addf %266, %267 : vector<8x256xf32>
    %cst_147 = arith.constant 0.000000e+00 : f32
    %269 = vector.broadcast %cst_147 : f32 to vector<8x256xf32>
    %270 = arith.maximumf %268, %269 : vector<8x256xf32>
    %c6_148 = arith.constant 6 : index
    %c0_149 = arith.constant 0 : index
    %c0_150 = arith.constant 0 : index
    %271 = vector.load %arg10[%c6_148, %c0_149, %c0_150] : memref<16x8x256xf32, #tpu.memory_space<vmem>>, vector<1x8x256xf32>
    %272 = vector.shape_cast %271 : vector<1x8x256xf32> to vector<8x256xf32>
    %273 = vector.shape_cast %270 : vector<8x256xf32> to vector<1x8x256xf32>
    tpu.vector_store %arg10[%c6_148, %c0_149, %c0_150], %273 {strides = array<i32>} : memref<16x8x256xf32, #tpu.memory_space<vmem>>, vector<1x8x256xf32>,
    %274 = vector.broadcast %186 : f32 to vector<8x256xf32>
    %275 = arith.mulf %264, %274 : vector<8x256xf32>
    %276 = vector.broadcast %187 : f32 to vector<8x256xf32>
    %277 = arith.addf %275, %276 : vector<8x256xf32>
    %c4_151 = arith.constant 4 : index
    %c0_152 = arith.constant 0 : index
    %c0_153 = arith.constant 0 : index
    %278 = vector.load %arg9[%c4_151, %c0_152, %c0_153] : memref<8x8x256xf32, #tpu.memory_space<vmem>>, vector<1x8x256xf32>
    %279 = vector.shape_cast %278 : vector<1x8x256xf32> to vector<8x256xf32>
    %280 = vector.broadcast %184 : f32 to vector<8x256xf32>
    %281 = arith.mulf %279, %280 : vector<8x256xf32>
    %282 = arith.addf %277, %281 : vector<8x256xf32>
    %cst_154 = arith.constant 0.000000e+00 : f32
    %283 = vector.broadcast %cst_154 : f32 to vector<8x256xf32>
    %284 = arith.maximumf %282, %283 : vector<8x256xf32>
    %c7_155 = arith.constant 7 : index
    %c0_156 = arith.constant 0 : index
    %c0_157 = arith.constant 0 : index
    %285 = vector.load %arg10[%c7_155, %c0_156, %c0_157] : memref<16x8x256xf32, #tpu.memory_space<vmem>>, vector<1x8x256xf32>
    %286 = vector.shape_cast %285 : vector<1x8x256xf32> to vector<8x256xf32>
    %287 = vector.shape_cast %284 : vector<8x256xf32> to vector<1x8x256xf32>
    tpu.vector_store %arg10[%c7_155, %c0_156, %c0_157], %287 {strides = array<i32>} : memref<16x8x256xf32, #tpu.memory_space<vmem>>, vector<1x8x256xf32>,
    %c4_158 = arith.constant 4 : index
    %c0_159 = arith.constant 0 : index
    %c0_160 = arith.constant 0 : index
    %288 = vector.load %arg9[%c4_158, %c0_159, %c0_160] : memref<8x8x256xf32, #tpu.memory_space<vmem>>, vector<1x8x256xf32>
    %289 = vector.shape_cast %288 : vector<1x8x256xf32> to vector<8x256xf32>
    %290 = vector.broadcast %185 : f32 to vector<8x256xf32>
    %291 = arith.mulf %289, %290 : vector<8x256xf32>
    %292 = vector.broadcast %187 : f32 to vector<8x256xf32>
    %293 = arith.addf %291, %292 : vector<8x256xf32>
    %cst_161 = arith.constant 0.000000e+00 : f32
    %294 = vector.broadcast %cst_161 : f32 to vector<8x256xf32>
    %295 = arith.maximumf %293, %294 : vector<8x256xf32>
    %c8_162 = arith.constant 8 : index
    %c0_163 = arith.constant 0 : index
    %c0_164 = arith.constant 0 : index
    %296 = vector.load %arg10[%c8_162, %c0_163, %c0_164] : memref<16x8x256xf32, #tpu.memory_space<vmem>>, vector<1x8x256xf32>
    %297 = vector.shape_cast %296 : vector<1x8x256xf32> to vector<8x256xf32>
    %298 = vector.shape_cast %295 : vector<8x256xf32> to vector<1x8x256xf32>
    tpu.vector_store %arg10[%c8_162, %c0_163, %c0_164], %298 {strides = array<i32>} : memref<16x8x256xf32, #tpu.memory_space<vmem>>, vector<1x8x256xf32>,
    %299 = vector.broadcast %186 : f32 to vector<8x256xf32>
    %300 = arith.mulf %289, %299 : vector<8x256xf32>
    %301 = vector.broadcast %187 : f32 to vector<8x256xf32>
    %302 = arith.addf %300, %301 : vector<8x256xf32>
    %c5_165 = arith.constant 5 : index
    %c0_166 = arith.constant 0 : index
    %c0_167 = arith.constant 0 : index
    %303 = vector.load %arg9[%c5_165, %c0_166, %c0_167] : memref<8x8x256xf32, #tpu.memory_space<vmem>>, vector<1x8x256xf32>
    %304 = vector.shape_cast %303 : vector<1x8x256xf32> to vector<8x256xf32>
    %305 = vector.broadcast %184 : f32 to vector<8x256xf32>
    %306 = arith.mulf %304, %305 : vector<8x256xf32>
    %307 = arith.addf %302, %306 : vector<8x256xf32>
    %cst_168 = arith.constant 0.000000e+00 : f32
    %308 = vector.broadcast %cst_168 : f32 to vector<8x256xf32>
    %309 = arith.maximumf %307, %308 : vector<8x256xf32>
    %c9_169 = arith.constant 9 : index
    %c0_170 = arith.constant 0 : index
    %c0_171 = arith.constant 0 : index
    %310 = vector.load %arg10[%c9_169, %c0_170, %c0_171] : memref<16x8x256xf32, #tpu.memory_space<vmem>>, vector<1x8x256xf32>
    %311 = vector.shape_cast %310 : vector<1x8x256xf32> to vector<8x256xf32>
    %312 = vector.shape_cast %309 : vector<8x256xf32> to vector<1x8x256xf32>
    tpu.vector_store %arg10[%c9_169, %c0_170, %c0_171], %312 {strides = array<i32>} : memref<16x8x256xf32, #tpu.memory_space<vmem>>, vector<1x8x256xf32>,
    %c5_172 = arith.constant 5 : index
    %c0_173 = arith.constant 0 : index
    %c0_174 = arith.constant 0 : index
    %313 = vector.load %arg9[%c5_172, %c0_173, %c0_174] : memref<8x8x256xf32, #tpu.memory_space<vmem>>, vector<1x8x256xf32>
    %314 = vector.shape_cast %313 : vector<1x8x256xf32> to vector<8x256xf32>
    %315 = vector.broadcast %185 : f32 to vector<8x256xf32>
    %316 = arith.mulf %314, %315 : vector<8x256xf32>
    %317 = vector.broadcast %187 : f32 to vector<8x256xf32>
    %318 = arith.addf %316, %317 : vector<8x256xf32>
    %cst_175 = arith.constant 0.000000e+00 : f32
    %319 = vector.broadcast %cst_175 : f32 to vector<8x256xf32>
    %320 = arith.maximumf %318, %319 : vector<8x256xf32>
    %c10_176 = arith.constant 10 : index
    %c0_177 = arith.constant 0 : index
    %c0_178 = arith.constant 0 : index
    %321 = vector.load %arg10[%c10_176, %c0_177, %c0_178] : memref<16x8x256xf32, #tpu.memory_space<vmem>>, vector<1x8x256xf32>
    %322 = vector.shape_cast %321 : vector<1x8x256xf32> to vector<8x256xf32>
    %323 = vector.shape_cast %320 : vector<8x256xf32> to vector<1x8x256xf32>
    tpu.vector_store %arg10[%c10_176, %c0_177, %c0_178], %323 {strides = array<i32>} : memref<16x8x256xf32, #tpu.memory_space<vmem>>, vector<1x8x256xf32>,
    %324 = vector.broadcast %186 : f32 to vector<8x256xf32>
    %325 = arith.mulf %314, %324 : vector<8x256xf32>
    %326 = vector.broadcast %187 : f32 to vector<8x256xf32>
    %327 = arith.addf %325, %326 : vector<8x256xf32>
    %c6_179 = arith.constant 6 : index
    %c0_180 = arith.constant 0 : index
    %c0_181 = arith.constant 0 : index
    %328 = vector.load %arg9[%c6_179, %c0_180, %c0_181] : memref<8x8x256xf32, #tpu.memory_space<vmem>>, vector<1x8x256xf32>
    %329 = vector.shape_cast %328 : vector<1x8x256xf32> to vector<8x256xf32>
    %330 = vector.broadcast %184 : f32 to vector<8x256xf32>
    %331 = arith.mulf %329, %330 : vector<8x256xf32>
    %332 = arith.addf %327, %331 : vector<8x256xf32>
    %cst_182 = arith.constant 0.000000e+00 : f32
    %333 = vector.broadcast %cst_182 : f32 to vector<8x256xf32>
    %334 = arith.maximumf %332, %333 : vector<8x256xf32>
    %c11_183 = arith.constant 11 : index
    %c0_184 = arith.constant 0 : index
    %c0_185 = arith.constant 0 : index
    %335 = vector.load %arg10[%c11_183, %c0_184, %c0_185] : memref<16x8x256xf32, #tpu.memory_space<vmem>>, vector<1x8x256xf32>
    %336 = vector.shape_cast %335 : vector<1x8x256xf32> to vector<8x256xf32>
    %337 = vector.shape_cast %334 : vector<8x256xf32> to vector<1x8x256xf32>
    tpu.vector_store %arg10[%c11_183, %c0_184, %c0_185], %337 {strides = array<i32>} : memref<16x8x256xf32, #tpu.memory_space<vmem>>, vector<1x8x256xf32>,
    %c6_186 = arith.constant 6 : index
    %c0_187 = arith.constant 0 : index
    %c0_188 = arith.constant 0 : index
    %338 = vector.load %arg9[%c6_186, %c0_187, %c0_188] : memref<8x8x256xf32, #tpu.memory_space<vmem>>, vector<1x8x256xf32>
    %339 = vector.shape_cast %338 : vector<1x8x256xf32> to vector<8x256xf32>
    %340 = vector.broadcast %185 : f32 to vector<8x256xf32>
    %341 = arith.mulf %339, %340 : vector<8x256xf32>
    %342 = vector.broadcast %187 : f32 to vector<8x256xf32>
    %343 = arith.addf %341, %342 : vector<8x256xf32>
    %cst_189 = arith.constant 0.000000e+00 : f32
    %344 = vector.broadcast %cst_189 : f32 to vector<8x256xf32>
    %345 = arith.maximumf %343, %344 : vector<8x256xf32>
    %c12 = arith.constant 12 : index
    %c0_190 = arith.constant 0 : index
    %c0_191 = arith.constant 0 : index
    %346 = vector.load %arg10[%c12, %c0_190, %c0_191] : memref<16x8x256xf32, #tpu.memory_space<vmem>>, vector<1x8x256xf32>
    %347 = vector.shape_cast %346 : vector<1x8x256xf32> to vector<8x256xf32>
    %348 = vector.shape_cast %345 : vector<8x256xf32> to vector<1x8x256xf32>
    tpu.vector_store %arg10[%c12, %c0_190, %c0_191], %348 {strides = array<i32>} : memref<16x8x256xf32, #tpu.memory_space<vmem>>, vector<1x8x256xf32>,
    %349 = vector.broadcast %186 : f32 to vector<8x256xf32>
    %350 = arith.mulf %339, %349 : vector<8x256xf32>
    %351 = vector.broadcast %187 : f32 to vector<8x256xf32>
    %352 = arith.addf %350, %351 : vector<8x256xf32>
    %c7_192 = arith.constant 7 : index
    %c0_193 = arith.constant 0 : index
    %c0_194 = arith.constant 0 : index
    %353 = vector.load %arg9[%c7_192, %c0_193, %c0_194] : memref<8x8x256xf32, #tpu.memory_space<vmem>>, vector<1x8x256xf32>
    %354 = vector.shape_cast %353 : vector<1x8x256xf32> to vector<8x256xf32>
    %355 = vector.broadcast %184 : f32 to vector<8x256xf32>
    %356 = arith.mulf %354, %355 : vector<8x256xf32>
    %357 = arith.addf %352, %356 : vector<8x256xf32>
    %cst_195 = arith.constant 0.000000e+00 : f32
    %358 = vector.broadcast %cst_195 : f32 to vector<8x256xf32>
    %359 = arith.maximumf %357, %358 : vector<8x256xf32>
    %c13 = arith.constant 13 : index
    %c0_196 = arith.constant 0 : index
    %c0_197 = arith.constant 0 : index
    %360 = vector.load %arg10[%c13, %c0_196, %c0_197] : memref<16x8x256xf32, #tpu.memory_space<vmem>>, vector<1x8x256xf32>
    %361 = vector.shape_cast %360 : vector<1x8x256xf32> to vector<8x256xf32>
    %362 = vector.shape_cast %359 : vector<8x256xf32> to vector<1x8x256xf32>
    tpu.vector_store %arg10[%c13, %c0_196, %c0_197], %362 {strides = array<i32>} : memref<16x8x256xf32, #tpu.memory_space<vmem>>, vector<1x8x256xf32>,
    %c7_198 = arith.constant 7 : index
    %c0_199 = arith.constant 0 : index
    %c0_200 = arith.constant 0 : index
    %363 = vector.load %arg9[%c7_198, %c0_199, %c0_200] : memref<8x8x256xf32, #tpu.memory_space<vmem>>, vector<1x8x256xf32>
    %364 = vector.shape_cast %363 : vector<1x8x256xf32> to vector<8x256xf32>
    %365 = vector.broadcast %185 : f32 to vector<8x256xf32>
    %366 = arith.mulf %364, %365 : vector<8x256xf32>
    %367 = vector.broadcast %187 : f32 to vector<8x256xf32>
    %368 = arith.addf %366, %367 : vector<8x256xf32>
    %cst_201 = arith.constant 0.000000e+00 : f32
    %369 = vector.broadcast %cst_201 : f32 to vector<8x256xf32>
    %370 = arith.maximumf %368, %369 : vector<8x256xf32>
    %c14 = arith.constant 14 : index
    %c0_202 = arith.constant 0 : index
    %c0_203 = arith.constant 0 : index
    %371 = vector.load %arg10[%c14, %c0_202, %c0_203] : memref<16x8x256xf32, #tpu.memory_space<vmem>>, vector<1x8x256xf32>
    %372 = vector.shape_cast %371 : vector<1x8x256xf32> to vector<8x256xf32>
    %373 = vector.shape_cast %370 : vector<8x256xf32> to vector<1x8x256xf32>
    tpu.vector_store %arg10[%c14, %c0_202, %c0_203], %373 {strides = array<i32>} : memref<16x8x256xf32, #tpu.memory_space<vmem>>, vector<1x8x256xf32>,
    %374 = vector.broadcast %186 : f32 to vector<8x256xf32>
    %375 = arith.mulf %364, %374 : vector<8x256xf32>
    %376 = vector.broadcast %187 : f32 to vector<8x256xf32>
    %377 = arith.addf %375, %376 : vector<8x256xf32>
    %cst_204 = arith.constant 0.000000e+00 : f32
    %378 = vector.broadcast %cst_204 : f32 to vector<8x256xf32>
    %379 = arith.maximumf %377, %378 : vector<8x256xf32>
    %c15 = arith.constant 15 : index
    %c0_205 = arith.constant 0 : index
    %c0_206 = arith.constant 0 : index
    %380 = vector.load %arg10[%c15, %c0_205, %c0_206] : memref<16x8x256xf32, #tpu.memory_space<vmem>>, vector<1x8x256xf32>
    %381 = vector.shape_cast %380 : vector<1x8x256xf32> to vector<8x256xf32>
    %382 = vector.shape_cast %379 : vector<8x256xf32> to vector<1x8x256xf32>
    tpu.vector_store %arg10[%c15, %c0_205, %c0_206], %382 {strides = array<i32>} : memref<16x8x256xf32, #tpu.memory_space<vmem>>, vector<1x8x256xf32>,
    %c12_207 = arith.constant 12 : index
    %383 = memref.load %arg6[%c12_207] : memref<15xf32, #tpu.memory_space<smem>>
    %c13_208 = arith.constant 13 : index
    %384 = memref.load %arg6[%c13_208] : memref<15xf32, #tpu.memory_space<smem>>
    %c14_209 = arith.constant 14 : index
    %385 = memref.load %arg6[%c14_209] : memref<15xf32, #tpu.memory_space<smem>>
    %c4_210 = arith.constant 4 : index
    %386 = memref.load %arg7[%c4_210] : memref<5xf32, #tpu.memory_space<smem>>
    %c0_211 = arith.constant 0 : index
    %c0_212 = arith.constant 0 : index
    %c0_213 = arith.constant 0 : index
    %387 = vector.load %arg10[%c0_211, %c0_212, %c0_213] : memref<16x8x256xf32, #tpu.memory_space<vmem>>, vector<1x8x256xf32>
    %388 = vector.shape_cast %387 : vector<1x8x256xf32> to vector<8x256xf32>
    %389 = vector.broadcast %384 : f32 to vector<8x256xf32>
    %390 = arith.mulf %388, %389 : vector<8x256xf32>
    %391 = vector.broadcast %386 : f32 to vector<8x256xf32>
    %392 = arith.addf %390, %391 : vector<8x256xf32>
    %393 = math.tanh %392 : vector<8x256xf32>
    %c0_214 = arith.constant 0 : index
    %c0_215 = arith.constant 0 : index
    %c0_216 = arith.constant 0 : index
    %c0_217 = arith.constant 0 : index
    %394 = vector.load %arg8[%c0_214, %c0_215, %c0_216, %c0_217] : memref<1x32x8x256xf32, #tpu.memory_space<vmem>>, vector<1x1x8x256xf32>
    %395 = vector.shape_cast %394 : vector<1x1x8x256xf32> to vector<8x256xf32>
    %396 = vector.shape_cast %393 : vector<8x256xf32> to vector<1x1x8x256xf32>
    tpu.vector_store %arg8[%c0_214, %c0_215, %c0_216, %c0_217], %396 {strides = array<i32>} : memref<1x32x8x256xf32, #tpu.memory_space<vmem>>, vector<1x1x8x256xf32>,
    %397 = vector.broadcast %385 : f32 to vector<8x256xf32>
    %398 = arith.mulf %388, %397 : vector<8x256xf32>
    %399 = vector.broadcast %386 : f32 to vector<8x256xf32>
    %400 = arith.addf %398, %399 : vector<8x256xf32>
    %c1_218 = arith.constant 1 : index
    %c0_219 = arith.constant 0 : index
    %c0_220 = arith.constant 0 : index
    %401 = vector.load %arg10[%c1_218, %c0_219, %c0_220] : memref<16x8x256xf32, #tpu.memory_space<vmem>>, vector<1x8x256xf32>
    %402 = vector.shape_cast %401 : vector<1x8x256xf32> to vector<8x256xf32>
    %403 = vector.broadcast %383 : f32 to vector<8x256xf32>
    %404 = arith.mulf %402, %403 : vector<8x256xf32>
    %405 = arith.addf %400, %404 : vector<8x256xf32>
    %406 = math.tanh %405 : vector<8x256xf32>
    %c0_221 = arith.constant 0 : index
    %c1_222 = arith.constant 1 : index
    %c0_223 = arith.constant 0 : index
    %c0_224 = arith.constant 0 : index
    %407 = vector.load %arg8[%c0_221, %c1_222, %c0_223, %c0_224] : memref<1x32x8x256xf32, #tpu.memory_space<vmem>>, vector<1x1x8x256xf32>
    %408 = vector.shape_cast %407 : vector<1x1x8x256xf32> to vector<8x256xf32>
    %409 = vector.shape_cast %406 : vector<8x256xf32> to vector<1x1x8x256xf32>
    tpu.vector_store %arg8[%c0_221, %c1_222, %c0_223, %c0_224], %409 {strides = array<i32>} : memref<1x32x8x256xf32, #tpu.memory_space<vmem>>, vector<1x1x8x256xf32>,
    %c1_225 = arith.constant 1 : index
    %c0_226 = arith.constant 0 : index
    %c0_227 = arith.constant 0 : index
    %410 = vector.load %arg10[%c1_225, %c0_226, %c0_227] : memref<16x8x256xf32, #tpu.memory_space<vmem>>, vector<1x8x256xf32>
    %411 = vector.shape_cast %410 : vector<1x8x256xf32> to vector<8x256xf32>
    %412 = vector.broadcast %384 : f32 to vector<8x256xf32>
    %413 = arith.mulf %411, %412 : vector<8x256xf32>
    %414 = vector.broadcast %386 : f32 to vector<8x256xf32>
    %415 = arith.addf %413, %414 : vector<8x256xf32>
    %416 = math.tanh %415 : vector<8x256xf32>
    %c0_228 = arith.constant 0 : index
    %c2_229 = arith.constant 2 : index
    %c0_230 = arith.constant 0 : index
    %c0_231 = arith.constant 0 : index
    %417 = vector.load %arg8[%c0_228, %c2_229, %c0_230, %c0_231] : memref<1x32x8x256xf32, #tpu.memory_space<vmem>>, vector<1x1x8x256xf32>
    %418 = vector.shape_cast %417 : vector<1x1x8x256xf32> to vector<8x256xf32>
    %419 = vector.shape_cast %416 : vector<8x256xf32> to vector<1x1x8x256xf32>
    tpu.vector_store %arg8[%c0_228, %c2_229, %c0_230, %c0_231], %419 {strides = array<i32>} : memref<1x32x8x256xf32, #tpu.memory_space<vmem>>, vector<1x1x8x256xf32>,
    %420 = vector.broadcast %385 : f32 to vector<8x256xf32>
    %421 = arith.mulf %411, %420 : vector<8x256xf32>
    %422 = vector.broadcast %386 : f32 to vector<8x256xf32>
    %423 = arith.addf %421, %422 : vector<8x256xf32>
    %c2_232 = arith.constant 2 : index
    %c0_233 = arith.constant 0 : index
    %c0_234 = arith.constant 0 : index
    %424 = vector.load %arg10[%c2_232, %c0_233, %c0_234] : memref<16x8x256xf32, #tpu.memory_space<vmem>>, vector<1x8x256xf32>
    %425 = vector.shape_cast %424 : vector<1x8x256xf32> to vector<8x256xf32>
    %426 = vector.broadcast %383 : f32 to vector<8x256xf32>
    %427 = arith.mulf %425, %426 : vector<8x256xf32>
    %428 = arith.addf %423, %427 : vector<8x256xf32>
    %429 = math.tanh %428 : vector<8x256xf32>
    %c0_235 = arith.constant 0 : index
    %c3_236 = arith.constant 3 : index
    %c0_237 = arith.constant 0 : index
    %c0_238 = arith.constant 0 : index
    %430 = vector.load %arg8[%c0_235, %c3_236, %c0_237, %c0_238] : memref<1x32x8x256xf32, #tpu.memory_space<vmem>>, vector<1x1x8x256xf32>
    %431 = vector.shape_cast %430 : vector<1x1x8x256xf32> to vector<8x256xf32>
    %432 = vector.shape_cast %429 : vector<8x256xf32> to vector<1x1x8x256xf32>
    tpu.vector_store %arg8[%c0_235, %c3_236, %c0_237, %c0_238], %432 {strides = array<i32>} : memref<1x32x8x256xf32, #tpu.memory_space<vmem>>, vector<1x1x8x256xf32>,
    %c2_239 = arith.constant 2 : index
    %c0_240 = arith.constant 0 : index
    %c0_241 = arith.constant 0 : index
    %433 = vector.load %arg10[%c2_239, %c0_240, %c0_241] : memref<16x8x256xf32, #tpu.memory_space<vmem>>, vector<1x8x256xf32>
    %434 = vector.shape_cast %433 : vector<1x8x256xf32> to vector<8x256xf32>
    %435 = vector.broadcast %384 : f32 to vector<8x256xf32>
    %436 = arith.mulf %434, %435 : vector<8x256xf32>
    %437 = vector.broadcast %386 : f32 to vector<8x256xf32>
    %438 = arith.addf %436, %437 : vector<8x256xf32>
    %439 = math.tanh %438 : vector<8x256xf32>
    %c0_242 = arith.constant 0 : index
    %c4_243 = arith.constant 4 : index
    %c0_244 = arith.constant 0 : index
    %c0_245 = arith.constant 0 : index
    %440 = vector.load %arg8[%c0_242, %c4_243, %c0_244, %c0_245] : memref<1x32x8x256xf32, #tpu.memory_space<vmem>>, vector<1x1x8x256xf32>
    %441 = vector.shape_cast %440 : vector<1x1x8x256xf32> to vector<8x256xf32>
    %442 = vector.shape_cast %439 : vector<8x256xf32> to vector<1x1x8x256xf32>
    tpu.vector_store %arg8[%c0_242, %c4_243, %c0_244, %c0_245], %442 {strides = array<i32>} : memref<1x32x8x256xf32, #tpu.memory_space<vmem>>, vector<1x1x8x256xf32>,
    %443 = vector.broadcast %385 : f32 to vector<8x256xf32>
    %444 = arith.mulf %434, %443 : vector<8x256xf32>
    %445 = vector.broadcast %386 : f32 to vector<8x256xf32>
    %446 = arith.addf %444, %445 : vector<8x256xf32>
    %c3_246 = arith.constant 3 : index
    %c0_247 = arith.constant 0 : index
    %c0_248 = arith.constant 0 : index
    %447 = vector.load %arg10[%c3_246, %c0_247, %c0_248] : memref<16x8x256xf32, #tpu.memory_space<vmem>>, vector<1x8x256xf32>
    %448 = vector.shape_cast %447 : vector<1x8x256xf32> to vector<8x256xf32>
    %449 = vector.broadcast %383 : f32 to vector<8x256xf32>
    %450 = arith.mulf %448, %449 : vector<8x256xf32>
    %451 = arith.addf %446, %450 : vector<8x256xf32>
    %452 = math.tanh %451 : vector<8x256xf32>
    %c0_249 = arith.constant 0 : index
    %c5_250 = arith.constant 5 : index
    %c0_251 = arith.constant 0 : index
    %c0_252 = arith.constant 0 : index
    %453 = vector.load %arg8[%c0_249, %c5_250, %c0_251, %c0_252] : memref<1x32x8x256xf32, #tpu.memory_space<vmem>>, vector<1x1x8x256xf32>
    %454 = vector.shape_cast %453 : vector<1x1x8x256xf32> to vector<8x256xf32>
    %455 = vector.shape_cast %452 : vector<8x256xf32> to vector<1x1x8x256xf32>
    tpu.vector_store %arg8[%c0_249, %c5_250, %c0_251, %c0_252], %455 {strides = array<i32>} : memref<1x32x8x256xf32, #tpu.memory_space<vmem>>, vector<1x1x8x256xf32>,
    %c3_253 = arith.constant 3 : index
    %c0_254 = arith.constant 0 : index
    %c0_255 = arith.constant 0 : index
    %456 = vector.load %arg10[%c3_253, %c0_254, %c0_255] : memref<16x8x256xf32, #tpu.memory_space<vmem>>, vector<1x8x256xf32>
    %457 = vector.shape_cast %456 : vector<1x8x256xf32> to vector<8x256xf32>
    %458 = vector.broadcast %384 : f32 to vector<8x256xf32>
    %459 = arith.mulf %457, %458 : vector<8x256xf32>
    %460 = vector.broadcast %386 : f32 to vector<8x256xf32>
    %461 = arith.addf %459, %460 : vector<8x256xf32>
    %462 = math.tanh %461 : vector<8x256xf32>
    %c0_256 = arith.constant 0 : index
    %c6_257 = arith.constant 6 : index
    %c0_258 = arith.constant 0 : index
    %c0_259 = arith.constant 0 : index
    %463 = vector.load %arg8[%c0_256, %c6_257, %c0_258, %c0_259] : memref<1x32x8x256xf32, #tpu.memory_space<vmem>>, vector<1x1x8x256xf32>
    %464 = vector.shape_cast %463 : vector<1x1x8x256xf32> to vector<8x256xf32>
    %465 = vector.shape_cast %462 : vector<8x256xf32> to vector<1x1x8x256xf32>
    tpu.vector_store %arg8[%c0_256, %c6_257, %c0_258, %c0_259], %465 {strides = array<i32>} : memref<1x32x8x256xf32, #tpu.memory_space<vmem>>, vector<1x1x8x256xf32>,
    %466 = vector.broadcast %385 : f32 to vector<8x256xf32>
    %467 = arith.mulf %457, %466 : vector<8x256xf32>
    %468 = vector.broadcast %386 : f32 to vector<8x256xf32>
    %469 = arith.addf %467, %468 : vector<8x256xf32>
    %c4_260 = arith.constant 4 : index
    %c0_261 = arith.constant 0 : index
    %c0_262 = arith.constant 0 : index
    %470 = vector.load %arg10[%c4_260, %c0_261, %c0_262] : memref<16x8x256xf32, #tpu.memory_space<vmem>>, vector<1x8x256xf32>
    %471 = vector.shape_cast %470 : vector<1x8x256xf32> to vector<8x256xf32>
    %472 = vector.broadcast %383 : f32 to vector<8x256xf32>
    %473 = arith.mulf %471, %472 : vector<8x256xf32>
    %474 = arith.addf %469, %473 : vector<8x256xf32>
    %475 = math.tanh %474 : vector<8x256xf32>
    %c0_263 = arith.constant 0 : index
    %c7_264 = arith.constant 7 : index
    %c0_265 = arith.constant 0 : index
    %c0_266 = arith.constant 0 : index
    %476 = vector.load %arg8[%c0_263, %c7_264, %c0_265, %c0_266] : memref<1x32x8x256xf32, #tpu.memory_space<vmem>>, vector<1x1x8x256xf32>
    %477 = vector.shape_cast %476 : vector<1x1x8x256xf32> to vector<8x256xf32>
    %478 = vector.shape_cast %475 : vector<8x256xf32> to vector<1x1x8x256xf32>
    tpu.vector_store %arg8[%c0_263, %c7_264, %c0_265, %c0_266], %478 {strides = array<i32>} : memref<1x32x8x256xf32, #tpu.memory_space<vmem>>, vector<1x1x8x256xf32>,
    %c4_267 = arith.constant 4 : index
    %c0_268 = arith.constant 0 : index
    %c0_269 = arith.constant 0 : index
    %479 = vector.load %arg10[%c4_267, %c0_268, %c0_269] : memref<16x8x256xf32, #tpu.memory_space<vmem>>, vector<1x8x256xf32>
    %480 = vector.shape_cast %479 : vector<1x8x256xf32> to vector<8x256xf32>
    %481 = vector.broadcast %384 : f32 to vector<8x256xf32>
    %482 = arith.mulf %480, %481 : vector<8x256xf32>
    %483 = vector.broadcast %386 : f32 to vector<8x256xf32>
    %484 = arith.addf %482, %483 : vector<8x256xf32>
    %485 = math.tanh %484 : vector<8x256xf32>
    %c0_270 = arith.constant 0 : index
    %c8_271 = arith.constant 8 : index
    %c0_272 = arith.constant 0 : index
    %c0_273 = arith.constant 0 : index
    %486 = vector.load %arg8[%c0_270, %c8_271, %c0_272, %c0_273] : memref<1x32x8x256xf32, #tpu.memory_space<vmem>>, vector<1x1x8x256xf32>
    %487 = vector.shape_cast %486 : vector<1x1x8x256xf32> to vector<8x256xf32>
    %488 = vector.shape_cast %485 : vector<8x256xf32> to vector<1x1x8x256xf32>
    tpu.vector_store %arg8[%c0_270, %c8_271, %c0_272, %c0_273], %488 {strides = array<i32>} : memref<1x32x8x256xf32, #tpu.memory_space<vmem>>, vector<1x1x8x256xf32>,
    %489 = vector.broadcast %385 : f32 to vector<8x256xf32>
    %490 = arith.mulf %480, %489 : vector<8x256xf32>
    %491 = vector.broadcast %386 : f32 to vector<8x256xf32>
    %492 = arith.addf %490, %491 : vector<8x256xf32>
    %c5_274 = arith.constant 5 : index
    %c0_275 = arith.constant 0 : index
    %c0_276 = arith.constant 0 : index
    %493 = vector.load %arg10[%c5_274, %c0_275, %c0_276] : memref<16x8x256xf32, #tpu.memory_space<vmem>>, vector<1x8x256xf32>
    %494 = vector.shape_cast %493 : vector<1x8x256xf32> to vector<8x256xf32>
    %495 = vector.broadcast %383 : f32 to vector<8x256xf32>
    %496 = arith.mulf %494, %495 : vector<8x256xf32>
    %497 = arith.addf %492, %496 : vector<8x256xf32>
    %498 = math.tanh %497 : vector<8x256xf32>
    %c0_277 = arith.constant 0 : index
    %c9_278 = arith.constant 9 : index
    %c0_279 = arith.constant 0 : index
    %c0_280 = arith.constant 0 : index
    %499 = vector.load %arg8[%c0_277, %c9_278, %c0_279, %c0_280] : memref<1x32x8x256xf32, #tpu.memory_space<vmem>>, vector<1x1x8x256xf32>
    %500 = vector.shape_cast %499 : vector<1x1x8x256xf32> to vector<8x256xf32>
    %501 = vector.shape_cast %498 : vector<8x256xf32> to vector<1x1x8x256xf32>
    tpu.vector_store %arg8[%c0_277, %c9_278, %c0_279, %c0_280], %501 {strides = array<i32>} : memref<1x32x8x256xf32, #tpu.memory_space<vmem>>, vector<1x1x8x256xf32>,
    %c5_281 = arith.constant 5 : index
    %c0_282 = arith.constant 0 : index
    %c0_283 = arith.constant 0 : index
    %502 = vector.load %arg10[%c5_281, %c0_282, %c0_283] : memref<16x8x256xf32, #tpu.memory_space<vmem>>, vector<1x8x256xf32>
    %503 = vector.shape_cast %502 : vector<1x8x256xf32> to vector<8x256xf32>
    %504 = vector.broadcast %384 : f32 to vector<8x256xf32>
    %505 = arith.mulf %503, %504 : vector<8x256xf32>
    %506 = vector.broadcast %386 : f32 to vector<8x256xf32>
    %507 = arith.addf %505, %506 : vector<8x256xf32>
    %508 = math.tanh %507 : vector<8x256xf32>
    %c0_284 = arith.constant 0 : index
    %c10_285 = arith.constant 10 : index
    %c0_286 = arith.constant 0 : index
    %c0_287 = arith.constant 0 : index
    %509 = vector.load %arg8[%c0_284, %c10_285, %c0_286, %c0_287] : memref<1x32x8x256xf32, #tpu.memory_space<vmem>>, vector<1x1x8x256xf32>
    %510 = vector.shape_cast %509 : vector<1x1x8x256xf32> to vector<8x256xf32>
    %511 = vector.shape_cast %508 : vector<8x256xf32> to vector<1x1x8x256xf32>
    tpu.vector_store %arg8[%c0_284, %c10_285, %c0_286, %c0_287], %511 {strides = array<i32>} : memref<1x32x8x256xf32, #tpu.memory_space<vmem>>, vector<1x1x8x256xf32>,
    %512 = vector.broadcast %385 : f32 to vector<8x256xf32>
    %513 = arith.mulf %503, %512 : vector<8x256xf32>
    %514 = vector.broadcast %386 : f32 to vector<8x256xf32>
    %515 = arith.addf %513, %514 : vector<8x256xf32>
    %c6_288 = arith.constant 6 : index
    %c0_289 = arith.constant 0 : index
    %c0_290 = arith.constant 0 : index
    %516 = vector.load %arg10[%c6_288, %c0_289, %c0_290] : memref<16x8x256xf32, #tpu.memory_space<vmem>>, vector<1x8x256xf32>
    %517 = vector.shape_cast %516 : vector<1x8x256xf32> to vector<8x256xf32>
    %518 = vector.broadcast %383 : f32 to vector<8x256xf32>
    %519 = arith.mulf %517, %518 : vector<8x256xf32>
    %520 = arith.addf %515, %519 : vector<8x256xf32>
    %521 = math.tanh %520 : vector<8x256xf32>
    %c0_291 = arith.constant 0 : index
    %c11_292 = arith.constant 11 : index
    %c0_293 = arith.constant 0 : index
    %c0_294 = arith.constant 0 : index
    %522 = vector.load %arg8[%c0_291, %c11_292, %c0_293, %c0_294] : memref<1x32x8x256xf32, #tpu.memory_space<vmem>>, vector<1x1x8x256xf32>
    %523 = vector.shape_cast %522 : vector<1x1x8x256xf32> to vector<8x256xf32>
    %524 = vector.shape_cast %521 : vector<8x256xf32> to vector<1x1x8x256xf32>
    tpu.vector_store %arg8[%c0_291, %c11_292, %c0_293, %c0_294], %524 {strides = array<i32>} : memref<1x32x8x256xf32, #tpu.memory_space<vmem>>, vector<1x1x8x256xf32>,
    %c6_295 = arith.constant 6 : index
    %c0_296 = arith.constant 0 : index
    %c0_297 = arith.constant 0 : index
    %525 = vector.load %arg10[%c6_295, %c0_296, %c0_297] : memref<16x8x256xf32, #tpu.memory_space<vmem>>, vector<1x8x256xf32>
    %526 = vector.shape_cast %525 : vector<1x8x256xf32> to vector<8x256xf32>
    %527 = vector.broadcast %384 : f32 to vector<8x256xf32>
    %528 = arith.mulf %526, %527 : vector<8x256xf32>
    %529 = vector.broadcast %386 : f32 to vector<8x256xf32>
    %530 = arith.addf %528, %529 : vector<8x256xf32>
    %531 = math.tanh %530 : vector<8x256xf32>
    %c0_298 = arith.constant 0 : index
    %c12_299 = arith.constant 12 : index
    %c0_300 = arith.constant 0 : index
    %c0_301 = arith.constant 0 : index
    %532 = vector.load %arg8[%c0_298, %c12_299, %c0_300, %c0_301] : memref<1x32x8x256xf32, #tpu.memory_space<vmem>>, vector<1x1x8x256xf32>
    %533 = vector.shape_cast %532 : vector<1x1x8x256xf32> to vector<8x256xf32>
    %534 = vector.shape_cast %531 : vector<8x256xf32> to vector<1x1x8x256xf32>
    tpu.vector_store %arg8[%c0_298, %c12_299, %c0_300, %c0_301], %534 {strides = array<i32>} : memref<1x32x8x256xf32, #tpu.memory_space<vmem>>, vector<1x1x8x256xf32>,
    %535 = vector.broadcast %385 : f32 to vector<8x256xf32>
    %536 = arith.mulf %526, %535 : vector<8x256xf32>
    %537 = vector.broadcast %386 : f32 to vector<8x256xf32>
    %538 = arith.addf %536, %537 : vector<8x256xf32>
    %c7_302 = arith.constant 7 : index
    %c0_303 = arith.constant 0 : index
    %c0_304 = arith.constant 0 : index
    %539 = vector.load %arg10[%c7_302, %c0_303, %c0_304] : memref<16x8x256xf32, #tpu.memory_space<vmem>>, vector<1x8x256xf32>
    %540 = vector.shape_cast %539 : vector<1x8x256xf32> to vector<8x256xf32>
    %541 = vector.broadcast %383 : f32 to vector<8x256xf32>
    %542 = arith.mulf %540, %541 : vector<8x256xf32>
    %543 = arith.addf %538, %542 : vector<8x256xf32>
    %544 = math.tanh %543 : vector<8x256xf32>
    %c0_305 = arith.constant 0 : index
    %c13_306 = arith.constant 13 : index
    %c0_307 = arith.constant 0 : index
    %c0_308 = arith.constant 0 : index
    %545 = vector.load %arg8[%c0_305, %c13_306, %c0_307, %c0_308] : memref<1x32x8x256xf32, #tpu.memory_space<vmem>>, vector<1x1x8x256xf32>
    %546 = vector.shape_cast %545 : vector<1x1x8x256xf32> to vector<8x256xf32>
    %547 = vector.shape_cast %544 : vector<8x256xf32> to vector<1x1x8x256xf32>
    tpu.vector_store %arg8[%c0_305, %c13_306, %c0_307, %c0_308], %547 {strides = array<i32>} : memref<1x32x8x256xf32, #tpu.memory_space<vmem>>, vector<1x1x8x256xf32>,
    %c7_309 = arith.constant 7 : index
    %c0_310 = arith.constant 0 : index
    %c0_311 = arith.constant 0 : index
    %548 = vector.load %arg10[%c7_309, %c0_310, %c0_311] : memref<16x8x256xf32, #tpu.memory_space<vmem>>, vector<1x8x256xf32>
    %549 = vector.shape_cast %548 : vector<1x8x256xf32> to vector<8x256xf32>
    %550 = vector.broadcast %384 : f32 to vector<8x256xf32>
    %551 = arith.mulf %549, %550 : vector<8x256xf32>
    %552 = vector.broadcast %386 : f32 to vector<8x256xf32>
    %553 = arith.addf %551, %552 : vector<8x256xf32>
    %554 = math.tanh %553 : vector<8x256xf32>
    %c0_312 = arith.constant 0 : index
    %c14_313 = arith.constant 14 : index
    %c0_314 = arith.constant 0 : index
    %c0_315 = arith.constant 0 : index
    %555 = vector.load %arg8[%c0_312, %c14_313, %c0_314, %c0_315] : memref<1x32x8x256xf32, #tpu.memory_space<vmem>>, vector<1x1x8x256xf32>
    %556 = vector.shape_cast %555 : vector<1x1x8x256xf32> to vector<8x256xf32>
    %557 = vector.shape_cast %554 : vector<8x256xf32> to vector<1x1x8x256xf32>
    tpu.vector_store %arg8[%c0_312, %c14_313, %c0_314, %c0_315], %557 {strides = array<i32>} : memref<1x32x8x256xf32, #tpu.memory_space<vmem>>, vector<1x1x8x256xf32>,
    %558 = vector.broadcast %385 : f32 to vector<8x256xf32>
    %559 = arith.mulf %549, %558 : vector<8x256xf32>
    %560 = vector.broadcast %386 : f32 to vector<8x256xf32>
    %561 = arith.addf %559, %560 : vector<8x256xf32>
    %c8_316 = arith.constant 8 : index
    %c0_317 = arith.constant 0 : index
    %c0_318 = arith.constant 0 : index
    %562 = vector.load %arg10[%c8_316, %c0_317, %c0_318] : memref<16x8x256xf32, #tpu.memory_space<vmem>>, vector<1x8x256xf32>
    %563 = vector.shape_cast %562 : vector<1x8x256xf32> to vector<8x256xf32>
    %564 = vector.broadcast %383 : f32 to vector<8x256xf32>
    %565 = arith.mulf %563, %564 : vector<8x256xf32>
    %566 = arith.addf %561, %565 : vector<8x256xf32>
    %567 = math.tanh %566 : vector<8x256xf32>
    %c0_319 = arith.constant 0 : index
    %c15_320 = arith.constant 15 : index
    %c0_321 = arith.constant 0 : index
    %c0_322 = arith.constant 0 : index
    %568 = vector.load %arg8[%c0_319, %c15_320, %c0_321, %c0_322] : memref<1x32x8x256xf32, #tpu.memory_space<vmem>>, vector<1x1x8x256xf32>
    %569 = vector.shape_cast %568 : vector<1x1x8x256xf32> to vector<8x256xf32>
    %570 = vector.shape_cast %567 : vector<8x256xf32> to vector<1x1x8x256xf32>
    tpu.vector_store %arg8[%c0_319, %c15_320, %c0_321, %c0_322], %570 {strides = array<i32>} : memref<1x32x8x256xf32, #tpu.memory_space<vmem>>, vector<1x1x8x256xf32>,
    %c8_323 = arith.constant 8 : index
    %c0_324 = arith.constant 0 : index
    %c0_325 = arith.constant 0 : index
    %571 = vector.load %arg10[%c8_323, %c0_324, %c0_325] : memref<16x8x256xf32, #tpu.memory_space<vmem>>, vector<1x8x256xf32>
    %572 = vector.shape_cast %571 : vector<1x8x256xf32> to vector<8x256xf32>
    %573 = vector.broadcast %384 : f32 to vector<8x256xf32>
    %574 = arith.mulf %572, %573 : vector<8x256xf32>
    %575 = vector.broadcast %386 : f32 to vector<8x256xf32>
    %576 = arith.addf %574, %575 : vector<8x256xf32>
    %577 = math.tanh %576 : vector<8x256xf32>
    %c0_326 = arith.constant 0 : index
    %c16 = arith.constant 16 : index
    %c0_327 = arith.constant 0 : index
    %c0_328 = arith.constant 0 : index
    %578 = vector.load %arg8[%c0_326, %c16, %c0_327, %c0_328] : memref<1x32x8x256xf32, #tpu.memory_space<vmem>>, vector<1x1x8x256xf32>
    %579 = vector.shape_cast %578 : vector<1x1x8x256xf32> to vector<8x256xf32>
    %580 = vector.shape_cast %577 : vector<8x256xf32> to vector<1x1x8x256xf32>
    tpu.vector_store %arg8[%c0_326, %c16, %c0_327, %c0_328], %580 {strides = array<i32>} : memref<1x32x8x256xf32, #tpu.memory_space<vmem>>, vector<1x1x8x256xf32>,
    %581 = vector.broadcast %385 : f32 to vector<8x256xf32>
    %582 = arith.mulf %572, %581 : vector<8x256xf32>
    %583 = vector.broadcast %386 : f32 to vector<8x256xf32>
    %584 = arith.addf %582, %583 : vector<8x256xf32>
    %c9_329 = arith.constant 9 : index
    %c0_330 = arith.constant 0 : index
    %c0_331 = arith.constant 0 : index
    %585 = vector.load %arg10[%c9_329, %c0_330, %c0_331] : memref<16x8x256xf32, #tpu.memory_space<vmem>>, vector<1x8x256xf32>
    %586 = vector.shape_cast %585 : vector<1x8x256xf32> to vector<8x256xf32>
    %587 = vector.broadcast %383 : f32 to vector<8x256xf32>
    %588 = arith.mulf %586, %587 : vector<8x256xf32>
    %589 = arith.addf %584, %588 : vector<8x256xf32>
    %590 = math.tanh %589 : vector<8x256xf32>
    %c0_332 = arith.constant 0 : index
    %c17 = arith.constant 17 : index
    %c0_333 = arith.constant 0 : index
    %c0_334 = arith.constant 0 : index
    %591 = vector.load %arg8[%c0_332, %c17, %c0_333, %c0_334] : memref<1x32x8x256xf32, #tpu.memory_space<vmem>>, vector<1x1x8x256xf32>
    %592 = vector.shape_cast %591 : vector<1x1x8x256xf32> to vector<8x256xf32>
    %593 = vector.shape_cast %590 : vector<8x256xf32> to vector<1x1x8x256xf32>
    tpu.vector_store %arg8[%c0_332, %c17, %c0_333, %c0_334], %593 {strides = array<i32>} : memref<1x32x8x256xf32, #tpu.memory_space<vmem>>, vector<1x1x8x256xf32>,
    %c9_335 = arith.constant 9 : index
    %c0_336 = arith.constant 0 : index
    %c0_337 = arith.constant 0 : index
    %594 = vector.load %arg10[%c9_335, %c0_336, %c0_337] : memref<16x8x256xf32, #tpu.memory_space<vmem>>, vector<1x8x256xf32>
    %595 = vector.shape_cast %594 : vector<1x8x256xf32> to vector<8x256xf32>
    %596 = vector.broadcast %384 : f32 to vector<8x256xf32>
    %597 = arith.mulf %595, %596 : vector<8x256xf32>
    %598 = vector.broadcast %386 : f32 to vector<8x256xf32>
    %599 = arith.addf %597, %598 : vector<8x256xf32>
    %600 = math.tanh %599 : vector<8x256xf32>
    %c0_338 = arith.constant 0 : index
    %c18 = arith.constant 18 : index
    %c0_339 = arith.constant 0 : index
    %c0_340 = arith.constant 0 : index
    %601 = vector.load %arg8[%c0_338, %c18, %c0_339, %c0_340] : memref<1x32x8x256xf32, #tpu.memory_space<vmem>>, vector<1x1x8x256xf32>
    %602 = vector.shape_cast %601 : vector<1x1x8x256xf32> to vector<8x256xf32>
    %603 = vector.shape_cast %600 : vector<8x256xf32> to vector<1x1x8x256xf32>
    tpu.vector_store %arg8[%c0_338, %c18, %c0_339, %c0_340], %603 {strides = array<i32>} : memref<1x32x8x256xf32, #tpu.memory_space<vmem>>, vector<1x1x8x256xf32>,
    %604 = vector.broadcast %385 : f32 to vector<8x256xf32>
    %605 = arith.mulf %595, %604 : vector<8x256xf32>
    %606 = vector.broadcast %386 : f32 to vector<8x256xf32>
    %607 = arith.addf %605, %606 : vector<8x256xf32>
    %c10_341 = arith.constant 10 : index
    %c0_342 = arith.constant 0 : index
    %c0_343 = arith.constant 0 : index
    %608 = vector.load %arg10[%c10_341, %c0_342, %c0_343] : memref<16x8x256xf32, #tpu.memory_space<vmem>>, vector<1x8x256xf32>
    %609 = vector.shape_cast %608 : vector<1x8x256xf32> to vector<8x256xf32>
    %610 = vector.broadcast %383 : f32 to vector<8x256xf32>
    %611 = arith.mulf %609, %610 : vector<8x256xf32>
    %612 = arith.addf %607, %611 : vector<8x256xf32>
    %613 = math.tanh %612 : vector<8x256xf32>
    %c0_344 = arith.constant 0 : index
    %c19 = arith.constant 19 : index
    %c0_345 = arith.constant 0 : index
    %c0_346 = arith.constant 0 : index
    %614 = vector.load %arg8[%c0_344, %c19, %c0_345, %c0_346] : memref<1x32x8x256xf32, #tpu.memory_space<vmem>>, vector<1x1x8x256xf32>
    %615 = vector.shape_cast %614 : vector<1x1x8x256xf32> to vector<8x256xf32>
    %616 = vector.shape_cast %613 : vector<8x256xf32> to vector<1x1x8x256xf32>
    tpu.vector_store %arg8[%c0_344, %c19, %c0_345, %c0_346], %616 {strides = array<i32>} : memref<1x32x8x256xf32, #tpu.memory_space<vmem>>, vector<1x1x8x256xf32>,
    %c10_347 = arith.constant 10 : index
    %c0_348 = arith.constant 0 : index
    %c0_349 = arith.constant 0 : index
    %617 = vector.load %arg10[%c10_347, %c0_348, %c0_349] : memref<16x8x256xf32, #tpu.memory_space<vmem>>, vector<1x8x256xf32>
    %618 = vector.shape_cast %617 : vector<1x8x256xf32> to vector<8x256xf32>
    %619 = vector.broadcast %384 : f32 to vector<8x256xf32>
    %620 = arith.mulf %618, %619 : vector<8x256xf32>
    %621 = vector.broadcast %386 : f32 to vector<8x256xf32>
    %622 = arith.addf %620, %621 : vector<8x256xf32>
    %623 = math.tanh %622 : vector<8x256xf32>
    %c0_350 = arith.constant 0 : index
    %c20 = arith.constant 20 : index
    %c0_351 = arith.constant 0 : index
    %c0_352 = arith.constant 0 : index
    %624 = vector.load %arg8[%c0_350, %c20, %c0_351, %c0_352] : memref<1x32x8x256xf32, #tpu.memory_space<vmem>>, vector<1x1x8x256xf32>
    %625 = vector.shape_cast %624 : vector<1x1x8x256xf32> to vector<8x256xf32>
    %626 = vector.shape_cast %623 : vector<8x256xf32> to vector<1x1x8x256xf32>
    tpu.vector_store %arg8[%c0_350, %c20, %c0_351, %c0_352], %626 {strides = array<i32>} : memref<1x32x8x256xf32, #tpu.memory_space<vmem>>, vector<1x1x8x256xf32>,
    %627 = vector.broadcast %385 : f32 to vector<8x256xf32>
    %628 = arith.mulf %618, %627 : vector<8x256xf32>
    %629 = vector.broadcast %386 : f32 to vector<8x256xf32>
    %630 = arith.addf %628, %629 : vector<8x256xf32>
    %c11_353 = arith.constant 11 : index
    %c0_354 = arith.constant 0 : index
    %c0_355 = arith.constant 0 : index
    %631 = vector.load %arg10[%c11_353, %c0_354, %c0_355] : memref<16x8x256xf32, #tpu.memory_space<vmem>>, vector<1x8x256xf32>
    %632 = vector.shape_cast %631 : vector<1x8x256xf32> to vector<8x256xf32>
    %633 = vector.broadcast %383 : f32 to vector<8x256xf32>
    %634 = arith.mulf %632, %633 : vector<8x256xf32>
    %635 = arith.addf %630, %634 : vector<8x256xf32>
    %636 = math.tanh %635 : vector<8x256xf32>
    %c0_356 = arith.constant 0 : index
    %c21 = arith.constant 21 : index
    %c0_357 = arith.constant 0 : index
    %c0_358 = arith.constant 0 : index
    %637 = vector.load %arg8[%c0_356, %c21, %c0_357, %c0_358] : memref<1x32x8x256xf32, #tpu.memory_space<vmem>>, vector<1x1x8x256xf32>
    %638 = vector.shape_cast %637 : vector<1x1x8x256xf32> to vector<8x256xf32>
    %639 = vector.shape_cast %636 : vector<8x256xf32> to vector<1x1x8x256xf32>
    tpu.vector_store %arg8[%c0_356, %c21, %c0_357, %c0_358], %639 {strides = array<i32>} : memref<1x32x8x256xf32, #tpu.memory_space<vmem>>, vector<1x1x8x256xf32>,
    %c11_359 = arith.constant 11 : index
    %c0_360 = arith.constant 0 : index
    %c0_361 = arith.constant 0 : index
    %640 = vector.load %arg10[%c11_359, %c0_360, %c0_361] : memref<16x8x256xf32, #tpu.memory_space<vmem>>, vector<1x8x256xf32>
    %641 = vector.shape_cast %640 : vector<1x8x256xf32> to vector<8x256xf32>
    %642 = vector.broadcast %384 : f32 to vector<8x256xf32>
    %643 = arith.mulf %641, %642 : vector<8x256xf32>
    %644 = vector.broadcast %386 : f32 to vector<8x256xf32>
    %645 = arith.addf %643, %644 : vector<8x256xf32>
    %646 = math.tanh %645 : vector<8x256xf32>
    %c0_362 = arith.constant 0 : index
    %c22 = arith.constant 22 : index
    %c0_363 = arith.constant 0 : index
    %c0_364 = arith.constant 0 : index
    %647 = vector.load %arg8[%c0_362, %c22, %c0_363, %c0_364] : memref<1x32x8x256xf32, #tpu.memory_space<vmem>>, vector<1x1x8x256xf32>
    %648 = vector.shape_cast %647 : vector<1x1x8x256xf32> to vector<8x256xf32>
    %649 = vector.shape_cast %646 : vector<8x256xf32> to vector<1x1x8x256xf32>
    tpu.vector_store %arg8[%c0_362, %c22, %c0_363, %c0_364], %649 {strides = array<i32>} : memref<1x32x8x256xf32, #tpu.memory_space<vmem>>, vector<1x1x8x256xf32>,
    %650 = vector.broadcast %385 : f32 to vector<8x256xf32>
    %651 = arith.mulf %641, %650 : vector<8x256xf32>
    %652 = vector.broadcast %386 : f32 to vector<8x256xf32>
    %653 = arith.addf %651, %652 : vector<8x256xf32>
    %c12_365 = arith.constant 12 : index
    %c0_366 = arith.constant 0 : index
    %c0_367 = arith.constant 0 : index
    %654 = vector.load %arg10[%c12_365, %c0_366, %c0_367] : memref<16x8x256xf32, #tpu.memory_space<vmem>>, vector<1x8x256xf32>
    %655 = vector.shape_cast %654 : vector<1x8x256xf32> to vector<8x256xf32>
    %656 = vector.broadcast %383 : f32 to vector<8x256xf32>
    %657 = arith.mulf %655, %656 : vector<8x256xf32>
    %658 = arith.addf %653, %657 : vector<8x256xf32>
    %659 = math.tanh %658 : vector<8x256xf32>
    %c0_368 = arith.constant 0 : index
    %c23 = arith.constant 23 : index
    %c0_369 = arith.constant 0 : index
    %c0_370 = arith.constant 0 : index
    %660 = vector.load %arg8[%c0_368, %c23, %c0_369, %c0_370] : memref<1x32x8x256xf32, #tpu.memory_space<vmem>>, vector<1x1x8x256xf32>
    %661 = vector.shape_cast %660 : vector<1x1x8x256xf32> to vector<8x256xf32>
    %662 = vector.shape_cast %659 : vector<8x256xf32> to vector<1x1x8x256xf32>
    tpu.vector_store %arg8[%c0_368, %c23, %c0_369, %c0_370], %662 {strides = array<i32>} : memref<1x32x8x256xf32, #tpu.memory_space<vmem>>, vector<1x1x8x256xf32>,
    %c12_371 = arith.constant 12 : index
    %c0_372 = arith.constant 0 : index
    %c0_373 = arith.constant 0 : index
    %663 = vector.load %arg10[%c12_371, %c0_372, %c0_373] : memref<16x8x256xf32, #tpu.memory_space<vmem>>, vector<1x8x256xf32>
    %664 = vector.shape_cast %663 : vector<1x8x256xf32> to vector<8x256xf32>
    %665 = vector.broadcast %384 : f32 to vector<8x256xf32>
    %666 = arith.mulf %664, %665 : vector<8x256xf32>
    %667 = vector.broadcast %386 : f32 to vector<8x256xf32>
    %668 = arith.addf %666, %667 : vector<8x256xf32>
    %669 = math.tanh %668 : vector<8x256xf32>
    %c0_374 = arith.constant 0 : index
    %c24 = arith.constant 24 : index
    %c0_375 = arith.constant 0 : index
    %c0_376 = arith.constant 0 : index
    %670 = vector.load %arg8[%c0_374, %c24, %c0_375, %c0_376] : memref<1x32x8x256xf32, #tpu.memory_space<vmem>>, vector<1x1x8x256xf32>
    %671 = vector.shape_cast %670 : vector<1x1x8x256xf32> to vector<8x256xf32>
    %672 = vector.shape_cast %669 : vector<8x256xf32> to vector<1x1x8x256xf32>
    tpu.vector_store %arg8[%c0_374, %c24, %c0_375, %c0_376], %672 {strides = array<i32>} : memref<1x32x8x256xf32, #tpu.memory_space<vmem>>, vector<1x1x8x256xf32>,
    %673 = vector.broadcast %385 : f32 to vector<8x256xf32>
    %674 = arith.mulf %664, %673 : vector<8x256xf32>
    %675 = vector.broadcast %386 : f32 to vector<8x256xf32>
    %676 = arith.addf %674, %675 : vector<8x256xf32>
    %c13_377 = arith.constant 13 : index
    %c0_378 = arith.constant 0 : index
    %c0_379 = arith.constant 0 : index
    %677 = vector.load %arg10[%c13_377, %c0_378, %c0_379] : memref<16x8x256xf32, #tpu.memory_space<vmem>>, vector<1x8x256xf32>
    %678 = vector.shape_cast %677 : vector<1x8x256xf32> to vector<8x256xf32>
    %679 = vector.broadcast %383 : f32 to vector<8x256xf32>
    %680 = arith.mulf %678, %679 : vector<8x256xf32>
    %681 = arith.addf %676, %680 : vector<8x256xf32>
    %682 = math.tanh %681 : vector<8x256xf32>
    %c0_380 = arith.constant 0 : index
    %c25 = arith.constant 25 : index
    %c0_381 = arith.constant 0 : index
    %c0_382 = arith.constant 0 : index
    %683 = vector.load %arg8[%c0_380, %c25, %c0_381, %c0_382] : memref<1x32x8x256xf32, #tpu.memory_space<vmem>>, vector<1x1x8x256xf32>
    %684 = vector.shape_cast %683 : vector<1x1x8x256xf32> to vector<8x256xf32>
    %685 = vector.shape_cast %682 : vector<8x256xf32> to vector<1x1x8x256xf32>
    tpu.vector_store %arg8[%c0_380, %c25, %c0_381, %c0_382], %685 {strides = array<i32>} : memref<1x32x8x256xf32, #tpu.memory_space<vmem>>, vector<1x1x8x256xf32>,
    %c13_383 = arith.constant 13 : index
    %c0_384 = arith.constant 0 : index
    %c0_385 = arith.constant 0 : index
    %686 = vector.load %arg10[%c13_383, %c0_384, %c0_385] : memref<16x8x256xf32, #tpu.memory_space<vmem>>, vector<1x8x256xf32>
    %687 = vector.shape_cast %686 : vector<1x8x256xf32> to vector<8x256xf32>
    %688 = vector.broadcast %384 : f32 to vector<8x256xf32>
    %689 = arith.mulf %687, %688 : vector<8x256xf32>
    %690 = vector.broadcast %386 : f32 to vector<8x256xf32>
    %691 = arith.addf %689, %690 : vector<8x256xf32>
    %692 = math.tanh %691 : vector<8x256xf32>
    %c0_386 = arith.constant 0 : index
    %c26 = arith.constant 26 : index
    %c0_387 = arith.constant 0 : index
    %c0_388 = arith.constant 0 : index
    %693 = vector.load %arg8[%c0_386, %c26, %c0_387, %c0_388] : memref<1x32x8x256xf32, #tpu.memory_space<vmem>>, vector<1x1x8x256xf32>
    %694 = vector.shape_cast %693 : vector<1x1x8x256xf32> to vector<8x256xf32>
    %695 = vector.shape_cast %692 : vector<8x256xf32> to vector<1x1x8x256xf32>
    tpu.vector_store %arg8[%c0_386, %c26, %c0_387, %c0_388], %695 {strides = array<i32>} : memref<1x32x8x256xf32, #tpu.memory_space<vmem>>, vector<1x1x8x256xf32>,
    %696 = vector.broadcast %385 : f32 to vector<8x256xf32>
    %697 = arith.mulf %687, %696 : vector<8x256xf32>
    %698 = vector.broadcast %386 : f32 to vector<8x256xf32>
    %699 = arith.addf %697, %698 : vector<8x256xf32>
    %c14_389 = arith.constant 14 : index
    %c0_390 = arith.constant 0 : index
    %c0_391 = arith.constant 0 : index
    %700 = vector.load %arg10[%c14_389, %c0_390, %c0_391] : memref<16x8x256xf32, #tpu.memory_space<vmem>>, vector<1x8x256xf32>
    %701 = vector.shape_cast %700 : vector<1x8x256xf32> to vector<8x256xf32>
    %702 = vector.broadcast %383 : f32 to vector<8x256xf32>
    %703 = arith.mulf %701, %702 : vector<8x256xf32>
    %704 = arith.addf %699, %703 : vector<8x256xf32>
    %705 = math.tanh %704 : vector<8x256xf32>
    %c0_392 = arith.constant 0 : index
    %c27 = arith.constant 27 : index
    %c0_393 = arith.constant 0 : index
    %c0_394 = arith.constant 0 : index
    %706 = vector.load %arg8[%c0_392, %c27, %c0_393, %c0_394] : memref<1x32x8x256xf32, #tpu.memory_space<vmem>>, vector<1x1x8x256xf32>
    %707 = vector.shape_cast %706 : vector<1x1x8x256xf32> to vector<8x256xf32>
    %708 = vector.shape_cast %705 : vector<8x256xf32> to vector<1x1x8x256xf32>
    tpu.vector_store %arg8[%c0_392, %c27, %c0_393, %c0_394], %708 {strides = array<i32>} : memref<1x32x8x256xf32, #tpu.memory_space<vmem>>, vector<1x1x8x256xf32>,
    %c14_395 = arith.constant 14 : index
    %c0_396 = arith.constant 0 : index
    %c0_397 = arith.constant 0 : index
    %709 = vector.load %arg10[%c14_395, %c0_396, %c0_397] : memref<16x8x256xf32, #tpu.memory_space<vmem>>, vector<1x8x256xf32>
    %710 = vector.shape_cast %709 : vector<1x8x256xf32> to vector<8x256xf32>
    %711 = vector.broadcast %384 : f32 to vector<8x256xf32>
    %712 = arith.mulf %710, %711 : vector<8x256xf32>
    %713 = vector.broadcast %386 : f32 to vector<8x256xf32>
    %714 = arith.addf %712, %713 : vector<8x256xf32>
    %715 = math.tanh %714 : vector<8x256xf32>
    %c0_398 = arith.constant 0 : index
    %c28 = arith.constant 28 : index
    %c0_399 = arith.constant 0 : index
    %c0_400 = arith.constant 0 : index
    %716 = vector.load %arg8[%c0_398, %c28, %c0_399, %c0_400] : memref<1x32x8x256xf32, #tpu.memory_space<vmem>>, vector<1x1x8x256xf32>
    %717 = vector.shape_cast %716 : vector<1x1x8x256xf32> to vector<8x256xf32>
    %718 = vector.shape_cast %715 : vector<8x256xf32> to vector<1x1x8x256xf32>
    tpu.vector_store %arg8[%c0_398, %c28, %c0_399, %c0_400], %718 {strides = array<i32>} : memref<1x32x8x256xf32, #tpu.memory_space<vmem>>, vector<1x1x8x256xf32>,
    %719 = vector.broadcast %385 : f32 to vector<8x256xf32>
    %720 = arith.mulf %710, %719 : vector<8x256xf32>
    %721 = vector.broadcast %386 : f32 to vector<8x256xf32>
    %722 = arith.addf %720, %721 : vector<8x256xf32>
    %c15_401 = arith.constant 15 : index
    %c0_402 = arith.constant 0 : index
    %c0_403 = arith.constant 0 : index
    %723 = vector.load %arg10[%c15_401, %c0_402, %c0_403] : memref<16x8x256xf32, #tpu.memory_space<vmem>>, vector<1x8x256xf32>
    %724 = vector.shape_cast %723 : vector<1x8x256xf32> to vector<8x256xf32>
    %725 = vector.broadcast %383 : f32 to vector<8x256xf32>
    %726 = arith.mulf %724, %725 : vector<8x256xf32>
    %727 = arith.addf %722, %726 : vector<8x256xf32>
    %728 = math.tanh %727 : vector<8x256xf32>
    %c0_404 = arith.constant 0 : index
    %c29 = arith.constant 29 : index
    %c0_405 = arith.constant 0 : index
    %c0_406 = arith.constant 0 : index
    %729 = vector.load %arg8[%c0_404, %c29, %c0_405, %c0_406] : memref<1x32x8x256xf32, #tpu.memory_space<vmem>>, vector<1x1x8x256xf32>
    %730 = vector.shape_cast %729 : vector<1x1x8x256xf32> to vector<8x256xf32>
    %731 = vector.shape_cast %728 : vector<8x256xf32> to vector<1x1x8x256xf32>
    tpu.vector_store %arg8[%c0_404, %c29, %c0_405, %c0_406], %731 {strides = array<i32>} : memref<1x32x8x256xf32, #tpu.memory_space<vmem>>, vector<1x1x8x256xf32>,
    %c15_407 = arith.constant 15 : index
    %c0_408 = arith.constant 0 : index
    %c0_409 = arith.constant 0 : index
    %732 = vector.load %arg10[%c15_407, %c0_408, %c0_409] : memref<16x8x256xf32, #tpu.memory_space<vmem>>, vector<1x8x256xf32>
    %733 = vector.shape_cast %732 : vector<1x8x256xf32> to vector<8x256xf32>
    %734 = vector.broadcast %384 : f32 to vector<8x256xf32>
    %735 = arith.mulf %733, %734 : vector<8x256xf32>
    %736 = vector.broadcast %386 : f32 to vector<8x256xf32>
    %737 = arith.addf %735, %736 : vector<8x256xf32>
    %738 = math.tanh %737 : vector<8x256xf32>
    %c0_410 = arith.constant 0 : index
    %c30 = arith.constant 30 : index
    %c0_411 = arith.constant 0 : index
    %c0_412 = arith.constant 0 : index
    %739 = vector.load %arg8[%c0_410, %c30, %c0_411, %c0_412] : memref<1x32x8x256xf32, #tpu.memory_space<vmem>>, vector<1x1x8x256xf32>
    %740 = vector.shape_cast %739 : vector<1x1x8x256xf32> to vector<8x256xf32>
    %741 = vector.shape_cast %738 : vector<8x256xf32> to vector<1x1x8x256xf32>
    tpu.vector_store %arg8[%c0_410, %c30, %c0_411, %c0_412], %741 {strides = array<i32>} : memref<1x32x8x256xf32, #tpu.memory_space<vmem>>, vector<1x1x8x256xf32>,
    %742 = vector.broadcast %385 : f32 to vector<8x256xf32>
    %743 = arith.mulf %733, %742 : vector<8x256xf32>
    %744 = vector.broadcast %386 : f32 to vector<8x256xf32>
    %745 = arith.addf %743, %744 : vector<8x256xf32>
    %746 = math.tanh %745 : vector<8x256xf32>
    %c0_413 = arith.constant 0 : index
    %c31 = arith.constant 31 : index
    %c0_414 = arith.constant 0 : index
    %c0_415 = arith.constant 0 : index
    %747 = vector.load %arg8[%c0_413, %c31, %c0_414, %c0_415] : memref<1x32x8x256xf32, #tpu.memory_space<vmem>>, vector<1x1x8x256xf32>
    %748 = vector.shape_cast %747 : vector<1x1x8x256xf32> to vector<8x256xf32>
    %749 = vector.shape_cast %746 : vector<8x256xf32> to vector<1x1x8x256xf32>
    tpu.vector_store %arg8[%c0_413, %c31, %c0_414, %c0_415], %749 {strides = array<i32>} : memref<1x32x8x256xf32, #tpu.memory_space<vmem>>, vector<1x1x8x256xf32>,
    return
  }
  func.func @transform_0(%arg0: i32) -> (i32, i32) {
    %c0_i32 = arith.constant 0 : i32
    %c0_i32_0 = arith.constant 0 : i32
    return %arg0, %c0_i32 : i32, i32
  }
  func.func @transform_1(%arg0: i32) -> (i32, i32) {
    %c0_i32 = arith.constant 0 : i32
    %c0_i32_0 = arith.constant 0 : i32
    %c0_i32_1 = arith.constant 0 : i32
    return %c0_i32, %c0_i32_0 : i32, i32
  }
  func.func @transform_2(%arg0: i32) -> (i32, i32) {
    %c0_i32 = arith.constant 0 : i32
    %c0_i32_0 = arith.constant 0 : i32
    %c0_i32_1 = arith.constant 0 : i32
    return %c0_i32, %c0_i32_0 : i32, i32
  }
  func.func @transform_3(%arg0: i32) -> (i32, i32) {
    %c0_i32 = arith.constant 0 : i32
    %c0_i32_0 = arith.constant 0 : i32
    %c0_i32_1 = arith.constant 0 : i32
    return %c0_i32, %c0_i32_0 : i32, i32
  }
  func.func @transform_4(%arg0: i32) -> (i32, i32) {
    %c0_i32 = arith.constant 0 : i32
    %c0_i32_0 = arith.constant 0 : i32
    %c0_i32_1 = arith.constant 0 : i32
    return %c0_i32, %c0_i32_0 : i32, i32
  }
  func.func @transform_5(%arg0: i32) -> i32 {
    %c0_i32 = arith.constant 0 : i32
    %c0_i32_0 = arith.constant 0 : i32
    return %c0_i32 : i32
  }
  func.func @transform_6(%arg0: i32) -> i32 {
    %c0_i32 = arith.constant 0 : i32
    %c0_i32_0 = arith.constant 0 : i32
    return %c0_i32 : i32
  }
  func.func @transform_7(%arg0: i32) -> (i32, i32, i32, i32) {
    %c0_i32 = arith.constant 0 : i32
    %c0_i32_0 = arith.constant 0 : i32
    %c0_i32_1 = arith.constant 0 : i32
    %c0_i32_2 = arith.constant 0 : i32
    return %arg0, %c0_i32, %c0_i32_0, %c0_i32_1 : i32, i32, i32, i32
  }
}

</mosaic_0001>

<bundles_post_ra>
// kernel: decoder_forward.1
= control target key start
LH: loop header
LB: loop body
LE: loop exit
PB: predicated region body
PF: predicated region fallthrough
CT: control target
= control target key end

     0   :  { %12 = vsyncpa [#allocation5], 0  ;;  %s2235_s0 = inlined_call_operand.vmem [shape: f32[8,32], index: 0, kind: input, shape index: {}]   ;;  %s2236_s1 = inlined_call_operand.hbm [shape: f32[32,256], index: 1, kind: input, shape index: {}]   ;;  %s2237_s2 = inlined_call_operand.vmem [shape: f32[1,256], index: 2, kind: input, shape index: {}]   ;;  %s2238_s3 = inlined_call_operand.hbm [shape: f32[256,256], index: 3, kind: input, shape index: {}]   ;;  %s2239_s4 = inlined_call_operand.vmem [shape: f32[1,256], index: 4, kind: input, shape index: {}]   ;;  %s2240_s5 = inlined_call_operand.vmem [shape: f32[15], index: 5, kind: input, shape index: {}]   ;;  %s2241_s6 = inlined_call_operand.vmem [shape: f32[5], index: 6, kind: input, shape index: {}]   ;;  %s2242_s7 = inlined_call_operand.vmem [shape: f32[1,32,8,256], index: 7, kind: output, shape index: {}]  }
   0x1   :  { %13 = vsyncpa [#allocation8], 0 }
   0x2   :  { %14 = vsyncpa [#allocation6], 0 }
   0x3   :  { %15 = vsyncpa [#allocation11], 0  ;;  %s1501_s24 = smov [#allocation4]   ;;  %s1425_s28 = scalar_lea.hbm %s2236_s1, 1024 }
   0x4   :  { %s23_s25 = sshll.u32 %s1501_s24, 4  ;;  %p1426_p0 = scmp.ne.s32.totalorder %s2236_s1, %s1425_s28  ;;  %s24_s25 = int_to_ptr.vmem [resolvable:$true] %s23_s25 }
   0x5   :  { %p1429_p1 = scmp.lt.u32.totalorder %s1425_s28, %s2236_s1 }
   0x7   :  { %p1431_p2 = pnand %p1429_p1, %p1426_p0 }
   0x9   :  { %1434 = shalt.err (!%p1431_p2)
}
   0xa   :  { %s1435_s10 = scalar_lea.vmem %s24_s25, 1024  ;;  %p1440_p4 = scmp.lt.s32.totalorder %s24_s25, %s24_s25 }
   0xb   :  { %p1436_p3 = scmp.ne.s32.totalorder %s24_s25, %s1435_s10  ;;  %p1441_p5 = scmp.lt.s32.totalorder %s1435_s10, %s1435_s10 }
   0xd   :  { %p1442_p6 = por %p1441_p5, %p1440_p4 }
   0xf   :  { %p1443_p7 = pnand %p1442_p6, %p1436_p3 }
  0x11   :  { %1446 = shalt.err (!%p1443_p7)
}
  0x12   :  { %s1502_s11 = smov 256   ;;  %s1503_s12 = smov 16  }
  0x13   :  { %29 = dma.hbm_to_vmem [thread:$0]  %s2236_s1, 1024, %s24_s25, [#allocation5], %s1502_s11, %s1502_s11, %s1503_s12  }
  0x14   :  { %s1504_s15 = smov [#allocation7]   ;;  %s52_s19 = sshll.u32 %s2240_s5, 4  ;;  %s53_s19 = int_to_ptr.vmem [resolvable:$true] %s52_s19 }
  0x15   :  { %s37_s16 = sshll.u32 %s1504_s15, 4  ;;  %s1447_s22 = scalar_lea.hbm %s2238_s3, 8192  ;;  %s38_s16 = int_to_ptr.vmem [resolvable:$true] %s37_s16 }
  0x16   :  { %p1448_p8 = scmp.ne.s32.totalorder %s2238_s3, %s1447_s22  ;;  %p1451_p9 = scmp.lt.u32.totalorder %s1447_s22, %s2238_s3 }
  0x18   :  { %p1453_p10 = pnand %p1451_p9, %p1448_p8 }
  0x1a   :  { %1456 = shalt.err (!%p1453_p10)
}
  0x1b   :  { %s1457_s1 = scalar_lea.vmem %s38_s16, 8192  ;;  %p1462_p12 = scmp.lt.s32.totalorder %s38_s16, %s38_s16 }
  0x1c   :  { %p1458_p11 = scmp.ne.s32.totalorder %s38_s16, %s1457_s1  ;;  %p1463_p13 = scmp.lt.s32.totalorder %s1457_s1, %s1457_s1 }
  0x1e   :  { %p1464_p0 = por %p1463_p13, %p1462_p12 }
  0x20   :  { %p1465_p1 = pnand %p1464_p0, %p1458_p11 }
  0x22   :  { %1468 = shalt.err (!%p1465_p1)
}
  0x23   :  { %43 = dma.hbm_to_vmem [thread:$0]  %s2238_s3, 8192, %s38_s16, [#allocation8], %s1502_s11, %s1502_s11, %s1503_s12  }
  0x24   :  { %s62_s30 = sshll.u32 %s2241_s6, 4  ;;  %s1469_s8 = scalar_lea.vmem %s53_s19, 16  ;;  %s63_s30 = int_to_ptr.vmem [resolvable:$true] %s62_s30 }
  0x25   :  { %p1470_p2 = scmp.ne.s32.totalorder %s53_s19, %s1469_s8  ;;  %p1474_p3 = scmp.lt.s32.totalorder %s53_s19, %s53_s19 }
  0x26   :  { %p1475_p4 = scmp.lt.s32.totalorder %s1469_s8, %s1469_s8 }
  0x28   :  { %p1476_p5 = por %p1475_p4, %p1474_p3 }
  0x2a   :  { %p1477_p6 = pnand %p1476_p5, %p1470_p2 }
  0x2c   :  { %1480 = shalt.err (!%p1477_p6)
}
  0x2d   :  { %s1505_s9 = smov [#allocation9]   ;;  %s1481_s10 = scalar_lea.vmem %s63_s30, 16 }
  0x2e   :  { %55 = dma.vmem_to_smem %s53_s19, 16, %s1505_s9, [#allocation6]  }
  0x2f   :  { %p1482_p7 = scmp.ne.s32.totalorder %s63_s30, %s1481_s10  ;;  %p1486_p8 = scmp.lt.s32.totalorder %s63_s30, %s63_s30 }
  0x30   :  { %p1487_p9 = scmp.lt.s32.totalorder %s1481_s10, %s1481_s10 }
  0x32   :  { %p1488_p10 = por %p1487_p9, %p1486_p8 }
  0x34   :  { %p1489_p11 = pnand %p1488_p10, %p1482_p7 }
  0x36   :  { %1492 = shalt.err (!%p1489_p11)
}
  0x37   :  { %s1506_s3 = smov [#allocation10]  }
  0x38   :  { %65 = dma.vmem_to_smem %s63_s30, 16, %s1506_s3, [#allocation11]  }
  0x39   :  { %1493 = dma.done.wait [#allocation5], 1024  }
  0x3a   :  { %1494 = vsyncadd [#allocation5], 4294966272 }
  0x3b   :  { %1495 = dma.done.wait [#allocation8], 8192  }
  0x3c   :  { %1496 = vsyncadd [#allocation8], 4294959104 }
  0x3d   :  { %1497 = dma.done.wait [#allocation6], 16  }
  0x3e   :  { %1498 = vsyncadd [#allocation6], 4294967280 }
  0x3f   :  { %1499 = dma.done.wait [#allocation11], 16  }
  0x40   :  { %1500 = vsyncadd [#allocation11], 4294967280 }
  0x41   :  { %78 = sfence }
  0x42   :  { %v81_v0 = vld [vmem:[#allocation4 + $0x8] sm:$0xff]  ;;  %v83_v1 = vld [vmem:[#allocation4 + $0x18] sm:$0xff]  ;;  %v80_v2 = vld [vmem:[#allocation4] sm:$0xff]  ;;  %v1507_v7 = vmov 0.0   ;;  %vm100_vm0 = vcmask 261120   ;;  %s1584_s13 = sld [smem:[#allocation9 + $0x1]] }
  0x43   :  { %v1218_v3 = vpack.c.bf16 %v83_v1, %v81_v0  ;;  %v82_v4 = vld [vmem:[#allocation4 + $0x10] sm:$0xff]  ;;  %v85_v5 = vld [vmem:[#allocation4 + $0x28] sm:$0xff]  ;;  %v87_v6 = vld [vmem:[#allocation4 + $0x38] sm:$0xff]  ;;  %168 = vmatprep.mubr.f32.mxu0 %v1507_v7  ;;  %s1589_s16 = sld [smem:[#allocation9 + $0x2]]  ;;  %s1591_s17 = sld [smem:[#allocation9 + $0x3]] }
  0x44   :  { %v1220_v8 = vpack.c.bf16 %v82_v4, %v80_v2  ;;  %v1222_v9 = vpack.c.bf16 %v87_v6, %v85_v5  ;;  %v84_v10 = vld [vmem:[#allocation4 + $0x20] sm:$0xff]  ;;  %v86_v11 = vld [vmem:[#allocation4 + $0x30] sm:$0xff]  ;;  %v178_v12 = vld [vmem:[#allocation7 + $0x8] sm:$0xff]  ;;  %s1141_s18 = sld [smem:[#allocation9 + $0x4]]  ;;  %s1142_s19 = sld [smem:[#allocation9 + $0x5]] }
  0x45   :  { %1219 = vmatprep.subr.bf16.mxu0 %v1218_v3  ;;  %v180_v13 = vld [vmem:[#allocation7 + $0x18] sm:$0xff]  ;;  %v177_v14 = vld [vmem:[#allocation7] sm:$0xff]  ;;  %v1224_v15 = vpack.c.bf16 %v86_v11, %v84_v10  ;;  %v179_v17 = vld [vmem:[#allocation7 + $0x10] sm:$0xff]  ;;  %s1143_s20 = sld [smem:[#allocation10 + $0x1]]  ;;  %s1144_s21 = sld [smem:[#allocation9 + $0x6]] }
  0x46   :  { %1221 = vmatpush1.bf16.msra.mxu0 %v1220_v8  ;;  %v1226_v16 = vpack.c.bf16 %v180_v13, %v178_v12  ;;  %v182_v18 = vld [vmem:[#allocation7 + $0x28] sm:$0xff]  ;;  %v184_v19 = vld [vmem:[#allocation7 + $0x38] sm:$0xff]  ;;  %v1228_v20 = vpack.c.bf16 %v179_v17, %v177_v14  ;;  %v181_v22 = vld [vmem:[#allocation7 + $0x20] sm:$0xff]  ;;  %s1145_s22 = sld [smem:[#allocation9 + $0x7]]  ;;  %s1146_s23 = sld [smem:[#allocation9 + $0x8]] }
  0x47   :  { %1223 = vmatprep.subr.bf16.mxu0 %v1222_v9  ;;  %v1230_v21 = vpack.c.bf16 %v184_v19, %v182_v18  ;;  %v183_v23 = vld [vmem:[#allocation7 + $0x30] sm:$0xff]  ;;  %v186_v24 = vld [vmem:[#allocation7 + $0x48] sm:$0xff]  ;;  %v188_v25 = vld [vmem:[#allocation7 + $0x58] sm:$0xff]  ;;  %s1147_s24 = sld [smem:[#allocation10 + $0x2]]  ;;  %s1593_s26 = sld [smem:[#allocation9 + $0x9]] }
  0x48   :  { %1227 = vmatprep.subr.bf16.mxu1 %v1226_v16  ;;  %v1232_v26 = vpack.c.bf16 %v183_v23, %v181_v22  ;;  %v79_v27 = vld [vmem:[%s2235_s0] sm:$0xff]  ;;  %v1234_v28 = vpack.c.bf16 %v188_v25, %v186_v24  ;;  %v187_v30 = vld [vmem:[#allocation7 + $0x50] sm:$0xff]  ;;  %v190_v31 = vld [vmem:[#allocation7 + $0x68] sm:$0xff]  ;;  %s1149_s27 = sld [smem:[#allocation9 + $0xa]]  ;;  %s1151_s1 = sld [smem:[#allocation10 + $0x3]] }
  0x49   :  { %1229 = vmatpush1.bf16.msra.mxu1 %v1228_v20  ;;  %v185_v29 = vld [vmem:[#allocation7 + $0x40] sm:$0xff]  ;;  %v192_v32 = vld [vmem:[#allocation7 + $0x78] sm:$0xff]  ;;  %v191_v36 = vld [vmem:[#allocation7 + $0x70] sm:$0xff]  ;;  %s1597_s5 = sld [smem:[#allocation9 + $0xc]]  ;;  %s1599_s25 = sld [smem:[#allocation9 + $0xd]] }
  0x4a   :  { %1225 = vmatpush1.bf16.msra.mxu0 %v1224_v15  ;;  %1231 = vmatprep.subr.bf16.mxu1 %v1230_v21  ;;  %v1236_v33 = vpack.c.bf16 %v187_v30, %v185_v29  ;;  %v1238_v34 = vpack.c.bf16 %v192_v32, %v190_v31  ;;  %v189_v35 = vld [vmem:[#allocation7 + $0x60] sm:$0xff]  ;;  %v194_v37 = vld [vmem:[#allocation7 + $0x88] sm:$0xff]  ;;  %v196_v38 = vld [vmem:[#allocation7 + $0x98] sm:$0xff]  ;;  %s1603_s28 = sld [smem:[#allocation9 + $0xe]]  ;;  %s1155_s29 = sld [smem:[#allocation10 + $0x4]] }
  0x4b   :  { %v1240_v39 = vpack.c.bf16 %v191_v36, %v189_v35  ;;  %v1242_v40 = vpack.c.bf16 %v196_v38, %v194_v37  ;;  %v193_v41 = vld [vmem:[#allocation7 + $0x80] sm:$0xff]  ;;  %v195_v42 = vld [vmem:[#allocation7 + $0x90] sm:$0xff]  ;;  %v198_v43 = vld [vmem:[#allocation7 + $0xa8] sm:$0xff] }
  0x4c   :  { %v200_v44 = vld [vmem:[#allocation7 + $0xb8] sm:$0xff]  ;;  %v1244_v45 = vpack.c.bf16 %v195_v42, %v193_v41  ;;  %v197_v47 = vld [vmem:[#allocation7 + $0xa0] sm:$0xff]  ;;  %v199_v48 = vld [vmem:[#allocation7 + $0xb0] sm:$0xff] }
  0x4d   :  { %1137 = vmatmul.mubr.msk.f32.vlgmr.msra.gmra.mrb[0].mxu0 %vm100_vm0, %v79_v27  ;;  %1233 = vmatpush1.bf16.msra.mxu1 %v1232_v26  ;;  %v1246_v46 = vpack.c.bf16 %v200_v44, %v198_v43  ;;  %v202_v49 = vld [vmem:[#allocation7 + $0xc8] sm:$0xff]  ;;  %v204_v50 = vld [vmem:[#allocation7 + $0xd8] sm:$0xff]  ;;  %v1248_v51 = vpack.c.bf16 %v199_v48, %v197_v47  ;;  %v201_v53 = vld [vmem:[#allocation7 + $0xc0] sm:$0xff] }
  0x4e   :  { %1235 = vmatprep.subr.bf16.mxu1 %v1234_v28  ;;  %v1250_v52 = vpack.c.bf16 %v204_v50, %v202_v49  ;;  %v203_v54 = vld [vmem:[#allocation7 + $0xd0] sm:$0xff]  ;;  %v206_v55 = vld [vmem:[#allocation7 + $0xe8] sm:$0xff]  ;;  %v208_v56 = vld [vmem:[#allocation7 + $0xf8] sm:$0xff] }
  0x4f   :  { %v1252_v57 = vpack.c.bf16 %v203_v54, %v201_v53  ;;  %v1254_v58 = vpack.c.bf16 %v208_v56, %v206_v55  ;;  %v205_v59 = vld [vmem:[#allocation7 + $0xe0] sm:$0xff]  ;;  %v207_v60 = vld [vmem:[#allocation7 + $0xf0] sm:$0xff]  ;;  %v210_v61 = vld [vmem:[#allocation7 + $0x108] sm:$0xff] }
  0x50   :  { %v212_v62 = vld [vmem:[#allocation7 + $0x118] sm:$0xff]  ;;  %v1256_v63 = vpack.c.bf16 %v207_v60, %v205_v59  ;;  %v209_v1 = vld [vmem:[#allocation7 + $0x100] sm:$0xff]  ;;  %v211_v2 = vld [vmem:[#allocation7 + $0x110] sm:$0xff] }
  0x51   :  { %1237 = vmatpush1.bf16.msra.mxu1 %v1236_v33  ;;  %v1258_v0 = vpack.c.bf16 %v212_v62, %v210_v61  ;;  %v214_v3 = vld [vmem:[#allocation7 + $0x128] sm:$0xff]  ;;  %v216_v4 = vld [vmem:[#allocation7 + $0x138] sm:$0xff]  ;;  %v1260_v5 = vpack.c.bf16 %v211_v2, %v209_v1  ;;  %v213_v7 = vld [vmem:[#allocation7 + $0x120] sm:$0xff]  ;;  %v329_v1 = vstv %s1584_s13  ;;  %v339_v2 = vstv %s1589_s16 }
  0x52   :  { %1239 = vmatprep.subr.bf16.mxu1 %v1238_v34  ;;  %v1262_v6 = vpack.c.bf16 %v216_v4, %v214_v3  ;;  %v215_v8 = vld [vmem:[#allocation7 + $0x130] sm:$0xff]  ;;  %v218_v9 = vld [vmem:[#allocation7 + $0x148] sm:$0xff]  ;;  %v220_v10 = vld [vmem:[#allocation7 + $0x158] sm:$0xff] }
  0x53   :  { %v1264_v11 = vpack.c.bf16 %v215_v8, %v213_v7  ;;  %v1266_v12 = vpack.c.bf16 %v220_v10, %v218_v9  ;;  %v217_v13 = vld [vmem:[#allocation7 + $0x140] sm:$0xff]  ;;  %v219_v14 = vld [vmem:[#allocation7 + $0x150] sm:$0xff]  ;;  %v222_v15 = vld [vmem:[#allocation7 + $0x168] sm:$0xff]  ;;  %v358_v7 = vstv %s1143_s20  ;;  %v365_v8 = vstv %s1142_s19 }
  0x54   :  { %v224_v16 = vld [vmem:[#allocation7 + $0x178] sm:$0xff]  ;;  %v1268_v17 = vpack.c.bf16 %v219_v14, %v217_v13  ;;  %v221_v19 = vld [vmem:[#allocation7 + $0x160] sm:$0xff]  ;;  %v223_v20 = vld [vmem:[#allocation7 + $0x170] sm:$0xff]  ;;  %v372_v9 = vstv %s1591_s17  ;;  %v1606_v13 = vstv %s1145_s22  ;;  %v1608_v14 = vstv %s1144_s21 }
  0x55   :  { %1241 = vmatpush1.bf16.msra.mxu1 %v1240_v39  ;;  %v1270_v18 = vpack.c.bf16 %v224_v16, %v222_v15  ;;  %v226_v21 = vld [vmem:[#allocation7 + $0x188] sm:$0xff]  ;;  %v228_v22 = vld [vmem:[#allocation7 + $0x198] sm:$0xff]  ;;  %v1272_v23 = vpack.c.bf16 %v223_v20, %v221_v19  ;;  %v225_v25 = vld [vmem:[#allocation7 + $0x180] sm:$0xff]  ;;  %v1610_v15 = vstv %s1147_s24  ;;  %v1612_v16 = vstv %s1146_s23 }
  0x56   :  { %1243 = vmatprep.subr.bf16.mxu1 %v1242_v40  ;;  %v1274_v24 = vpack.c.bf16 %v228_v22, %v226_v21  ;;  %v227_v26 = vld [vmem:[#allocation7 + $0x190] sm:$0xff]  ;;  %v230_v27 = vld [vmem:[#allocation7 + $0x1a8] sm:$0xff]  ;;  %v232_v28 = vld [vmem:[#allocation7 + $0x1b8] sm:$0xff]  ;;  %v1614_v21 = vstv %s1149_s27  ;;  %v1617_v22 = vstv %s1593_s26 }
  0x57   :  { %v1276_v29 = vpack.c.bf16 %v227_v26, %v225_v25  ;;  %v1278_v30 = vpack.c.bf16 %v232_v28, %v230_v27  ;;  %v229_v31 = vld [vmem:[#allocation7 + $0x1a0] sm:$0xff]  ;;  %v231_v32 = vld [vmem:[#allocation7 + $0x1b0] sm:$0xff]  ;;  %v234_v33 = vld [vmem:[#allocation7 + $0x1c8] sm:$0xff] }
  0x58   :  { %v236_v34 = vld [vmem:[#allocation7 + $0x1d8] sm:$0xff]  ;;  %v1280_v35 = vpack.c.bf16 %v231_v32, %v229_v31  ;;  %v233_v37 = vld [vmem:[#allocation7 + $0x1c0] sm:$0xff]  ;;  %v235_v38 = vld [vmem:[#allocation7 + $0x1d0] sm:$0xff]  ;;  %v1630_v31 = vstv %s1155_s29  ;;  %v1633_v32 = vstv %s1603_s28 }
  0x59   :  { %1245 = vmatpush1.bf16.msra.mxu1 %v1244_v45  ;;  %v1282_v36 = vpack.c.bf16 %v236_v34, %v234_v33  ;;  %v1284_v39 = vpack.c.bf16 %v235_v38, %v233_v37  ;;  %v238_v40 = vld [vmem:[#allocation7 + $0x1e8] sm:$0xff]  ;;  %v240_v41 = vld [vmem:[#allocation7 + $0x1f8] sm:$0xff]  ;;  %v237_v43 = vld [vmem:[#allocation7 + $0x1e0] sm:$0xff] }
  0x5a   :  { %1247 = vmatprep.subr.bf16.mxu1 %v1246_v46  ;;  %v1286_v42 = vpack.c.bf16 %v240_v41, %v238_v40  ;;  %v239_v44 = vld [vmem:[#allocation7 + $0x1f0] sm:$0xff]  ;;  %v90_v46 = vlaneseq  ;;  %v88_v49 = vld [vmem:[%s2237_s2] sm:$0x3]  ;;  %s328_s2 = sld [smem:[#allocation10]] }
  0x5b   :  { %v1288_v45 = vpack.c.bf16 %v239_v44, %v237_v43  ;;  %v241_v59 = vld [vmem:[%s2239_s4] sm:$0x3]  ;;  %s1595_s4 = sld [smem:[#allocation9 + $0xb]] }
  0x5c   :  { %v91_v47 = vshrl.u32 %v90_v46, 7 }
  0x5d   :  { %1249 = vmatpush1.bf16.msra.mxu1 %v1248_v51 }
  0x5e   :  { %1251 = vmatprep.subr.bf16.mxu1 %v1250_v52  ;;  %v92_v48 = vsub.s32 0, %v91_v47  ;;  %v96_v50 = vsub.s32 1, %v91_v47 }
  0x60   :  { %v93_v51 = vrot.slane %v88_v49, %v92_v48  ;;  %v97_v52 = vrot.slane %v88_v49, %v96_v50  ;;  %v246_v60 = vrot.slane %v241_v59, %v92_v48  ;;  %v250_v61 = vrot.slane %v241_v59, %v96_v50 }
  0x61   :  { %1253 = vmatpush1.bf16.msra.mxu1 %v1252_v57 }
  0x62   :  { %1255 = vmatprep.subr.bf16.mxu1 %v1254_v58 }
  0x65   :  { %1257 = vmatpush1.bf16.msra.mxu1 %v1256_v63 }
  0x66   :  { %1259 = vmatprep.subr.bf16.mxu1 %v1258_v0 }
  0x69   :  { %1261 = vmatpush1.bf16.msra.mxu1 %v1260_v5  ;;  %v332_v5 = vstv %s328_s2 }
  0x6a   :  { %1263 = vmatprep.subr.bf16.mxu1 %v1262_v6  ;;  %v355_v6 = vstv %s1141_s18 }
  0x6d   :  { %1265 = vmatpush1.bf16.msra.mxu1 %v1264_v11 }
  0x6e   :  { %1267 = vmatprep.subr.bf16.mxu1 %v1266_v12 }
  0x71   :  { %1269 = vmatpush1.bf16.msra.mxu1 %v1268_v17 }
  0x72   :  { %1271 = vmatprep.subr.bf16.mxu1 %v1270_v18 }
  0x75   :  { %1273 = vmatpush1.bf16.msra.mxu1 %v1272_v23  ;;  %v1619_v23 = vstv %s1151_s1 }
  0x76   :  { %1275 = vmatprep.subr.bf16.mxu1 %v1274_v24  ;;  %v1622_v24 = vstv %s1595_s4 }
  0x79   :  { %1277 = vmatpush1.bf16.msra.mxu1 %v1276_v29  ;;  %v1625_v29 = vstv %s1599_s25 }
  0x7a   :  { %1279 = vmatprep.subr.bf16.mxu1 %v1278_v30  ;;  %v1628_v30 = vstv %s1597_s5 }
  0x7d   :  { %1281 = vmatpush1.bf16.msra.mxu1 %v1280_v35 }
  0x7e   :  { %1283 = vmatprep.subr.bf16.mxu1 %v1282_v36 }
  0x81   :  { %1285 = vmatpush1.bf16.msra.mxu1 %v1284_v39 }
  0x82   :  { %1287 = vmatprep.subr.bf16.mxu1 %v1286_v42 }
  0x85   :  { %1289 = vmatpush1.bf16.msra.mxu1 %v1288_v45 }
 0x120   :  { %v170_v53 = vpop.f32.mrb[0].mxu0 }
 0x121   :  { %v171_v54 = vadd.f32 %v170_v53, %v93_v51  ;;  %v172_v55 = vpop.f32.mrb[1].mxu0 }
 0x122   :  { %v173_v56 = vadd.f32 %v172_v55, %v97_v52 }
 0x123   :  { %v175_v58 = vmax.f32 %v171_v54, 0.0 }
 0x124   :  { %v176_v57 = vmax.f32 %v173_v56, 0.0 }
 0x126   :  { %317 = vmatprep.mubr.f32.mxu1 %v176_v57 }
 0x127   :  { %318 = vmatmul.mubr.f32.vlgmr.msra.gmra.mrb[0].mxu1 %v175_v58 }
 0x1fa   :  { %v319_v62 = vpop.f32.mrb[0].mxu1 }
 0x1fb   :  { %v320_v63 = vadd.f32 %v319_v62, %v246_v60  ;;  %v321_v0 = vpop.f32.mrb[1].mxu1 }
 0x1fc   :  { %v322_v3 = vadd.f32 %v321_v0, %v250_v61 }
 0x1fd   :  { %v324_v4 = vmax.f32 %v320_v63, 0.0 }
 0x1fe   :  { %v325_v10 = vmax.f32 %v322_v3, 0.0 }
 0x1ff   :  { %v330_v11 = vmul.f32 %v329_v1, %v324_v4  ;;  %v340_v12 = vmul.f32 %v339_v2, %v324_v4 }
 0x200   :  { %v331_v17 = vmul.f32 %v329_v1, %v325_v10  ;;  %v341_v18 = vmul.f32 %v339_v2, %v325_v10 }
 0x201   :  { %v333_v19 = vadd.f32 %v332_v5, %v330_v11  ;;  %v342_v20 = vadd.f32 %v340_v12, %v332_v5 }
 0x202   :  { %v334_v25 = vadd.f32 %v332_v5, %v331_v17  ;;  %v343_v26 = vadd.f32 %v341_v18, %v332_v5 }
 0x203   :  { %v335_v27 = vmax.f32 %v333_v19, 0.0  ;;  %v344_v28 = vmax.f32 %v342_v20, 0.0 }
 0x204   :  { %v336_v33 = vmax.f32 %v334_v25, 0.0  ;;  %v345_v34 = vmax.f32 %v343_v26, 0.0 }
 0x205   :  { %v356_v35 = vmul.f32 %v355_v6, %v335_v27  ;;  %v366_v36 = vmul.f32 %v365_v8, %v335_v27  ;;  %v373_v37 = vmul.f32 %v372_v9, %v344_v28  ;;  %v384_v38 = vmul.f32 %v355_v6, %v344_v28 }
 0x206   :  { %v393_v39 = vmul.f32 %v365_v8, %v344_v28  ;;  %v357_v40 = vmul.f32 %v355_v6, %v336_v33  ;;  %v367_v41 = vmul.f32 %v365_v8, %v336_v33  ;;  %v374_v42 = vmul.f32 %v372_v9, %v345_v34 }
 0x207   :  { %v359_v43 = vadd.f32 %v358_v7, %v356_v35  ;;  %v368_v44 = vadd.f32 %v366_v36, %v358_v7  ;;  %v386_v45 = vadd.f32 %v384_v38, %v358_v7  ;;  %v385_v46 = vmul.f32 %v355_v6, %v345_v34 }
 0x208   :  { %v395_v47 = vadd.f32 %v393_v39, %v358_v7  ;;  %v1635_v48 = vadd.f32 %v358_v7, %v357_v40  ;;  %v369_v49 = vadd.f32 %v367_v41, %v358_v7  ;;  %v394_v50 = vmul.f32 %v365_v8, %v345_v34 }
 0x209   :  { %v361_v51 = vmax.f32 %v359_v43, 0.0  ;;  %v375_v52 = vadd.f32 %v373_v37, %v368_v44  ;;  %v388_v53 = vmax.f32 %v386_v45, 0.0  ;;  %v1637_v54 = vadd.f32 %v385_v46, %v358_v7 }
 0x20a   :  { %v397_v55 = vmax.f32 %v395_v47, 0.0  ;;  %v362_v56 = vmax.f32 %v1635_v48, 0.0  ;;  %v1640_v57 = vadd.f32 %v374_v42, %v369_v49  ;;  %v1642_v58 = vadd.f32 %v394_v50, %v358_v7 }
 0x20b   :  { %v377_v59 = vmax.f32 %v375_v52, 0.0  ;;  %v409_v60 = vmul.f32 %v1606_v13, %v361_v51  ;;  %v419_v61 = vmul.f32 %v1612_v16, %v361_v51  ;;  %v451_v62 = vmul.f32 %v1608_v14, %v388_v53 }
 0x20c   :  { %v462_v63 = vmul.f32 %v1606_v13, %v388_v53  ;;  %v471_v0 = vmul.f32 %v1612_v16, %v388_v53  ;;  %v477_v1 = vmul.f32 %v1608_v14, %v397_v55  ;;  %v488_v2 = vmul.f32 %v1606_v13, %v397_v55 }
 0x20d   :  { %v412_v3 = vadd.f32 %v1610_v15, %v409_v60  ;;  %v421_v4 = vadd.f32 %v419_v61, %v1610_v15  ;;  %v426_v5 = vmul.f32 %v1608_v14, %v377_v59  ;;  %v436_v6 = vmul.f32 %v1606_v13, %v377_v59 }
 0x20e   :  { %v445_v7 = vmul.f32 %v1612_v16, %v377_v59  ;;  %v464_v8 = vadd.f32 %v462_v63, %v1610_v15  ;;  %v473_v9 = vadd.f32 %v471_v0, %v1610_v15  ;;  %v490_v10 = vadd.f32 %v488_v2, %v1610_v15 }
 0x20f   :  { %v414_v11 = vmax.f32 %v412_v3, 0.0  ;;  %v428_v12 = vadd.f32 %v426_v5, %v421_v4  ;;  %v438_v17 = vadd.f32 %v436_v6, %v1610_v15  ;;  %v497_v18 = vmul.f32 %v1612_v16, %v397_v55 }
 0x210   :  { %v447_v19 = vadd.f32 %v445_v7, %v1610_v15  ;;  %v466_v20 = vmax.f32 %v464_v8, 0.0  ;;  %v479_v25 = vadd.f32 %v477_v1, %v473_v9  ;;  %v492_v26 = vmax.f32 %v490_v10, 0.0 }
 0x211   :  { %v430_v27 = vmax.f32 %v428_v12, 0.0  ;;  %v440_v28 = vmax.f32 %v438_v17, 0.0  ;;  %v499_v33 = vadd.f32 %v497_v18, %v1610_v15  ;;  %v513_v34 = vmul.f32 %v1614_v21, %v414_v11 }
 0x212   :  { %v453_v35 = vadd.f32 %v451_v62, %v447_v19  ;;  %v481_v36 = vmax.f32 %v479_v25, 0.0  ;;  %v523_v37 = vmul.f32 %v1622_v24, %v414_v11  ;;  %v605_v38 = vmul.f32 %v1617_v22, %v466_v20 }
 0x213   :  { %v501_v39 = vmax.f32 %v499_v33, 0.0  ;;  %v516_v40 = vadd.f32 %v1619_v23, %v513_v34  ;;  %v530_v41 = vmul.f32 %v1617_v22, %v430_v27  ;;  %v540_v42 = vmul.f32 %v1614_v21, %v430_v27 }
 0x214   :  { %v455_v43 = vmax.f32 %v453_v35, 0.0  ;;  %v525_v44 = vadd.f32 %v523_v37, %v1619_v23  ;;  %v548_v45 = vmul.f32 %v1622_v24, %v430_v27  ;;  %v554_v46 = vmul.f32 %v1617_v22, %v440_v28 }
 0x215   :  { %v518_v47 = vmax.f32 %v516_v40, 0.0  ;;  %v542_v49 = vadd.f32 %v540_v42, %v1619_v23  ;;  %v564_v50 = vmul.f32 %v1614_v21, %v440_v28  ;;  %v573_v51 = vmul.f32 %v1622_v24, %v440_v28 }
 0x216   :  { %v532_v52 = vadd.f32 %v530_v41, %v525_v44  ;;  %v550_v53 = vadd.f32 %v548_v45, %v1619_v23  ;;  %v579_v55 = vmul.f32 %v1617_v22, %v455_v43  ;;  %v590_v59 = vmul.f32 %v1614_v21, %v455_v43 }
 0x217   :  { %v544_v60 = vmax.f32 %v542_v49, 0.0  ;;  %v566_v61 = vadd.f32 %v564_v50, %v1619_v23  ;;  %v575_v62 = vadd.f32 %v573_v51, %v1619_v23  ;;  %v599_v63 = vmul.f32 %v1622_v24, %v455_v43 }
 0x218   :  { %v534_v0 = vmax.f32 %v532_v52, 0.0  ;;  %v556_v1 = vadd.f32 %v554_v46, %v550_v53  ;;  %v592_v2 = vadd.f32 %v590_v59, %v1619_v23  ;;  %v616_v3 = vmul.f32 %v1614_v21, %v466_v20 }
 0x219   :  { %v1683_v4 = vmax.f32 %v566_v61, 0.0  ;;  %v581_v5 = vadd.f32 %v579_v55, %v575_v62  ;;  %v601_v6 = vadd.f32 %v599_v63, %v1619_v23  ;;  %v625_v7 = vmul.f32 %v1622_v24, %v466_v20 }
 0x21a   :  { %v558_v8 = vmax.f32 %v556_v1, 0.0  ;;  %v1687_v9 = vmax.f32 %v592_v2, 0.0  ;;  %v618_v10 = vadd.f32 %v616_v3, %v1619_v23  ;;  %v631_v11 = vmul.f32 %v1617_v22, %v481_v36 }
 0x21b   :  { %v1691_v12 = vmax.f32 %v581_v5, 0.0  ;;  %v607_v17 = vadd.f32 %v605_v38, %v601_v6  ;;  %v627_v18 = vadd.f32 %v625_v7, %v1619_v23  ;;  %v642_v19 = vmul.f32 %v1614_v21, %v481_v36 }
 0x21c   :  { %v1695_v25 = vmax.f32 %v618_v10, 0.0  ;;  %v651_v27 = vmul.f32 %v1622_v24, %v481_v36  ;;  %v657_v20 = vmul.f32 %v1617_v22, %v492_v26  ;;  %v668_v28 = vmul.f32 %v1614_v21, %v492_v26 }
 0x21d   :  { %v1700_v33 = vmax.f32 %v607_v17, 0.0  ;;  %v633_v34 = vadd.f32 %v631_v11, %v627_v18  ;;  %v644_v35 = vadd.f32 %v642_v19, %v1619_v23  ;;  %v677_v37 = vmul.f32 %v1622_v24, %v492_v26 }
 0x21e   :  { %v653_v38 = vadd.f32 %v651_v27, %v1619_v23  ;;  %v670_v40 = vadd.f32 %v668_v28, %v1619_v23  ;;  %v683_v41 = vmul.f32 %v1617_v22, %v501_v39  ;;  %v694_v42 = vmul.f32 %v1614_v21, %v501_v39 }
 0x21f   :  { %v1708_v36 = vmax.f32 %v633_v34, 0.0  ;;  %v1710_v43 = vmax.f32 %v644_v35, 0.0  ;;  %v679_v44 = vadd.f32 %v677_v37, %v1619_v23  ;;  %v703_v45 = vmul.f32 %v1622_v24, %v501_v39 }
 0x220   :  { %v659_v46 = vadd.f32 %v657_v20, %v653_v38  ;;  %v1714_v49 = vmax.f32 %v670_v40, 0.0  ;;  %v696_v26 = vadd.f32 %v694_v42, %v1619_v23  ;;  %v719_v50 = vmul.f32 %v1625_v29, %v518_v47 }
 0x221   :  { %v685_v51 = vadd.f32 %v683_v41, %v679_v44  ;;  %v705_v52 = vadd.f32 %v703_v45, %v1619_v23  ;;  %v729_v53 = vmul.f32 %v1633_v32, %v518_v47  ;;  %v736_v55 = vmul.f32 %v1628_v30, %v534_v0 }
 0x222   :  { %v1721_v59 = vmax.f32 %v659_v46, 0.0  ;;  %v1723_v61 = vmax.f32 %v696_v26, 0.0  ;;  %v722_v39 = vadd.f32 %v1630_v31, %v719_v50  ;;  %v747_v62 = vmul.f32 %v1625_v29, %v534_v0 }
 0x223   :  { %v1727_v63 = vmax.f32 %v685_v51, 0.0  ;;  %v1729_v1 = vmax.f32 %v705_v52, 0.0  ;;  %v731_v2 = vadd.f32 %v729_v53, %v1630_v31  ;;  %v756_v3 = vmul.f32 %v1633_v32, %v534_v0 }
 0x224   :  { %1297 = vtanh.f32 %v722_v39  ;;  %v749_v47 = vadd.f32 %v747_v62, %v1630_v31  ;;  %v762_v5 = vmul.f32 %v1628_v30, %v544_v60  ;;  %v773_v6 = vmul.f32 %v1625_v29, %v544_v60 }
 0x225   :  { %v738_v7 = vadd.f32 %v736_v55, %v731_v2  ;;  %v758_v10 = vadd.f32 %v756_v3, %v1630_v31  ;;  %v782_v11 = vmul.f32 %v1633_v32, %v544_v60  ;;  %v788_v17 = vmul.f32 %v1628_v30, %v558_v8 }
 0x226   :  { %1299 = vtanh.f32 %v749_v47  ;;  %v775_v18 = vadd.f32 %v773_v6, %v1630_v31  ;;  %v799_v19 = vmul.f32 %v1625_v29, %v558_v8  ;;  %v808_v0 = vmul.f32 %v1633_v32, %v558_v8 }
 0x227   :  { %1301 = vtanh.f32 %v738_v7  ;;  %v764_v27 = vadd.f32 %v762_v5, %v758_v10  ;;  %v784_v20 = vadd.f32 %v782_v11, %v1630_v31  ;;  %v814_v28 = vmul.f32 %v1628_v30, %v1683_v4 }
 0x228   :  { %1303 = vtanh.f32 %v775_v18  ;;  %v801_v34 = vadd.f32 %v799_v19, %v1630_v31  ;;  %v810_v60 = vadd.f32 %v808_v0, %v1630_v31  ;;  %v825_v35 = vmul.f32 %v1625_v29, %v1683_v4 }
 0x229   :  { %1305 = vtanh.f32 %v764_v27  ;;  %v790_v37 = vadd.f32 %v788_v17, %v784_v20  ;;  %v834_v8 = vmul.f32 %v1633_v32, %v1683_v4  ;;  %v840_v38 = vmul.f32 %v1628_v30, %v1691_v12 }
 0x22a   :  { %1307 = vtanh.f32 %v801_v34  ;;  %v816_v40 = vadd.f32 %v814_v28, %v810_v60  ;;  %v827_v41 = vadd.f32 %v825_v35, %v1630_v31  ;;  %v851_v42 = vmul.f32 %v1625_v29, %v1691_v12 }
 0x22b   :  { %1309 = vtanh.f32 %v790_v37  ;;  %v836_v44 = vadd.f32 %v834_v8, %v1630_v31  ;;  %v860_v45 = vmul.f32 %v1633_v32, %v1691_v12  ;;  %v866_v46 = vmul.f32 %v1628_v30, %v1687_v9 }
 0x22c   :  { %1311 = vtanh.f32 %v816_v40  ;;  %v853_v4 = vadd.f32 %v851_v42, %v1630_v31  ;;  %v877_v26 = vmul.f32 %v1625_v29, %v1687_v9  ;;  %v886_v50 = vmul.f32 %v1633_v32, %v1687_v9 }
 0x22d   :  { %1313 = vtanh.f32 %v827_v41  ;;  %v842_v51 = vadd.f32 %v840_v38, %v836_v44  ;;  %v862_v52 = vadd.f32 %v860_v45, %v1630_v31  ;;  %v892_v53 = vmul.f32 %v1628_v30, %v1700_v33 }
 0x22e   :  { %v1298_v12 = vpop.eup %1297  ;;  %1315 = vtanh.f32 %v853_v4  ;;  %v879_v55 = vadd.f32 %v877_v26, %v1630_v31  ;;  %v888_v39 = vadd.f32 %v886_v50, %v1630_v31  ;;  %v903_v62 = vmul.f32 %v1625_v29, %v1700_v33 }
 0x22f   :  { %726 = vst [vmem:[%s2242_s7] sm:$0xff] %v1298_v12  ;;  %1317 = vtanh.f32 %v842_v51  ;;  %v868_v9 = vadd.f32 %v866_v46, %v862_v52  ;;  %v912_v2 = vmul.f32 %v1633_v32, %v1700_v33  ;;  %v918_v3 = vmul.f32 %v1628_v30, %v1695_v25 }
 0x230   :  { %v1300_v47 = vpop.eup %1299  ;;  %1319 = vtanh.f32 %v879_v55  ;;  %v894_v5 = vadd.f32 %v892_v53, %v888_v39  ;;  %v905_v6 = vadd.f32 %v903_v62, %v1630_v31  ;;  %v929_v7 = vmul.f32 %v1625_v29, %v1695_v25 }
 0x231   :  { %v1302_v10 = vpop.eup %1301  ;;  %1158 = vst [vmem:[%s2242_s7 + $0x20] sm:$0xff] %v1300_v47  ;;  %1321 = vtanh.f32 %v868_v9  ;;  %v914_v11 = vadd.f32 %v912_v2, %v1630_v31  ;;  %v938_v33 = vmul.f32 %v1633_v32, %v1695_v25  ;;  %v944_v17 = vmul.f32 %v1628_v30, %v1708_v36 }
 0x232   :  { %v1304_v18 = vpop.eup %1303  ;;  %1156 = vst [vmem:[%s2242_s7 + $0x10] sm:$0xff] %v1302_v10  ;;  %1323 = vtanh.f32 %v894_v5  ;;  %v931_v19 = vadd.f32 %v929_v7, %v1630_v31  ;;  %v955_v0 = vmul.f32 %v1625_v29, %v1708_v36  ;;  %v964_v27 = vmul.f32 %v1633_v32, %v1708_v36 }
 0x233   :  { %v1306_v20 = vpop.eup %1305  ;;  %1162 = vst [vmem:[%s2242_s7 + $0x40] sm:$0xff] %v1304_v18  ;;  %1325 = vtanh.f32 %v905_v6  ;;  %v920_v25 = vadd.f32 %v918_v3, %v914_v11  ;;  %v940_v28 = vadd.f32 %v938_v33, %v1630_v31  ;;  %v970_v34 = vmul.f32 %v1628_v30, %v1710_v43 }
 0x234   :  { %v1308_v60 = vpop.eup %1307  ;;  %1160 = vst [vmem:[%s2242_s7 + $0x30] sm:$0xff] %v1306_v20  ;;  %1327 = vtanh.f32 %v931_v19  ;;  %v957_v36 = vadd.f32 %v955_v0, %v1630_v31  ;;  %v966_v35 = vadd.f32 %v964_v27, %v1630_v31  ;;  %v981_v37 = vmul.f32 %v1625_v29, %v1710_v43 }
 0x235   :  { %v1310_v8 = vpop.eup %1309  ;;  %1166 = vst [vmem:[%s2242_s7 + $0x60] sm:$0xff] %v1308_v60  ;;  %1329 = vtanh.f32 %v920_v25  ;;  %v946_v38 = vadd.f32 %v944_v17, %v940_v28  ;;  %v990_v40 = vmul.f32 %v1633_v32, %v1710_v43  ;;  %v996_v41 = vmul.f32 %v1628_v30, %v1721_v59 }
 0x236   :  { %v1312_v42 = vpop.eup %1311  ;;  %1164 = vst [vmem:[%s2242_s7 + $0x50] sm:$0xff] %v1310_v8  ;;  %1331 = vtanh.f32 %v957_v36  ;;  %v972_v44 = vadd.f32 %v970_v34, %v966_v35  ;;  %v983_v45 = vadd.f32 %v981_v37, %v1630_v31  ;;  %v1007_v46 = vmul.f32 %v1625_v29, %v1721_v59 }
 0x237   :  { %v1314_v4 = vpop.eup %1313  ;;  %1168 = vst [vmem:[%s2242_s7 + $0x70] sm:$0xff] %v1312_v42  ;;  %1333 = vtanh.f32 %v946_v38  ;;  %v992_v43 = vadd.f32 %v990_v40, %v1630_v31  ;;  %v1016_v26 = vmul.f32 %v1633_v32, %v1721_v59  ;;  %v1022_v50 = vmul.f32 %v1628_v30, %v1714_v49 }
 0x238   :  { %v1316_v51 = vpop.eup %1315  ;;  %1170 = vst [vmem:[%s2242_s7 + $0x80] sm:$0xff] %v1314_v4  ;;  %1335 = vtanh.f32 %v972_v44  ;;  %v1009_v52 = vadd.f32 %v1007_v46, %v1630_v31  ;;  %v1033_v53 = vmul.f32 %v1625_v29, %v1714_v49  ;;  %v1042_v12 = vmul.f32 %v1633_v32, %v1714_v49 }
 0x239   :  { %v1318_v55 = vpop.eup %1317  ;;  %1174 = vst [vmem:[%s2242_s7 + $0xa0] sm:$0xff] %v1316_v51  ;;  %1337 = vtanh.f32 %v983_v45  ;;  %v998_v59 = vadd.f32 %v996_v41, %v992_v43  ;;  %v1018_v39 = vadd.f32 %v1016_v26, %v1630_v31  ;;  %v1048_v62 = vmul.f32 %v1628_v30, %v1727_v63 }
 0x23a   :  { %v1320_v9 = vpop.eup %1319  ;;  %1172 = vst [vmem:[%s2242_s7 + $0x90] sm:$0xff] %v1318_v55  ;;  %1339 = vtanh.f32 %v1009_v52  ;;  %v1035_v49 = vadd.f32 %v1033_v53, %v1630_v31  ;;  %v1044_v2 = vadd.f32 %v1042_v12, %v1630_v31  ;;  %v1059_v3 = vmul.f32 %v1625_v29, %v1727_v63 }
 0x23b   :  { %v1322_v47 = vpop.eup %1321  ;;  %1178 = vst [vmem:[%s2242_s7 + $0xc0] sm:$0xff] %v1320_v9  ;;  %1341 = vtanh.f32 %v998_v59  ;;  %v1024_v5 = vadd.f32 %v1022_v50, %v1018_v39  ;;  %v1068_v6 = vmul.f32 %v1633_v32, %v1727_v63  ;;  %v1074_v7 = vmul.f32 %v1628_v30, %v1723_v61 }
 0x23c   :  { %v1324_v10 = vpop.eup %1323  ;;  %1176 = vst [vmem:[%s2242_s7 + $0xb0] sm:$0xff] %v1322_v47  ;;  %1343 = vtanh.f32 %v1035_v49  ;;  %v1050_v11 = vadd.f32 %v1048_v62, %v1044_v2  ;;  %v1061_v33 = vadd.f32 %v1059_v3, %v1630_v31  ;;  %v1085_v17 = vmul.f32 %v1625_v29, %v1723_v61 }
 0x23d   :  { %v1326_v18 = vpop.eup %1325  ;;  %1180 = vst [vmem:[%s2242_s7 + $0xd0] sm:$0xff] %v1324_v10  ;;  %1345 = vtanh.f32 %v1024_v5  ;;  %v1070_v63 = vadd.f32 %v1068_v6, %v1630_v31  ;;  %v1094_v19 = vmul.f32 %v1633_v32, %v1723_v61  ;;  %v1100_v0 = vmul.f32 %v1628_v30, %v1729_v1 }
 0x23e   :  { %v1328_v27 = vpop.eup %1327  ;;  %1182 = vst [vmem:[%s2242_s7 + $0xe0] sm:$0xff] %v1326_v18  ;;  %1347 = vtanh.f32 %v1050_v11  ;;  %v1087_v20 = vadd.f32 %v1085_v17, %v1630_v31  ;;  %v1111_v25 = vmul.f32 %v1625_v29, %v1729_v1  ;;  %v1120_v28 = vmul.f32 %v1633_v32, %v1729_v1 }
 0x23f   :  { %v1330_v34 = vpop.eup %1329  ;;  %1186 = vst [vmem:[%s2242_s7 + $0x100] sm:$0xff] %v1328_v27  ;;  %1349 = vtanh.f32 %v1061_v33  ;;  %v1076_v61 = vadd.f32 %v1074_v7, %v1070_v63  ;;  %v1096_v60 = vadd.f32 %v1094_v19, %v1630_v31  ;;  %v378_v36 = vmax.f32 %v1640_v57, 0.0 }
 0x240   :  { %v1332_v35 = vpop.eup %1331  ;;  %1184 = vst [vmem:[%s2242_s7 + $0xf0] sm:$0xff] %v1330_v34  ;;  %1351 = vtanh.f32 %v1087_v20  ;;  %v1113_v37 = vadd.f32 %v1111_v25, %v1630_v31  ;;  %v1122_v1 = vadd.f32 %v1120_v28, %v1630_v31  ;;  %v389_v8 = vmax.f32 %v1637_v54, 0.0 }
 0x241   :  { %v1334_v38 = vpop.eup %1333  ;;  %1190 = vst [vmem:[%s2242_s7 + $0x120] sm:$0xff] %v1332_v35  ;;  %1353 = vtanh.f32 %v1076_v61  ;;  %v1102_v40 = vadd.f32 %v1100_v0, %v1096_v60  ;;  %v398_v57 = vmax.f32 %v1642_v58, 0.0  ;;  %v410_v41 = vmul.f32 %v1606_v13, %v362_v56 }
 0x242   :  { %v1336_v42 = vpop.eup %1335  ;;  %1188 = vst [vmem:[%s2242_s7 + $0x110] sm:$0xff] %v1334_v38  ;;  %1355 = vtanh.f32 %v1113_v37  ;;  %v420_v54 = vmul.f32 %v1612_v16, %v362_v56  ;;  %v427_v44 = vmul.f32 %v1608_v14, %v378_v36  ;;  %v437_v45 = vmul.f32 %v1606_v13, %v378_v36 }
 0x243   :  { %v1338_v46 = vpop.eup %1337  ;;  %1192 = vst [vmem:[%s2242_s7 + $0x130] sm:$0xff] %v1336_v42  ;;  %1357 = vtanh.f32 %v1102_v40  ;;  %v413_v58 = vadd.f32 %v1610_v15, %v410_v41  ;;  %v446_v4 = vmul.f32 %v1612_v16, %v378_v36  ;;  %v452_v43 = vmul.f32 %v1608_v14, %v389_v8 }
 0x244   :  { %v1340_v26 = vpop.eup %1339  ;;  %1194 = vst [vmem:[%s2242_s7 + $0x140] sm:$0xff] %v1338_v46  ;;  %1359 = vtanh.f32 %v1122_v1  ;;  %v422_v48 = vadd.f32 %v420_v54, %v1610_v15  ;;  %v439_v56 = vadd.f32 %v437_v45, %v1610_v15  ;;  %v463_v50 = vmul.f32 %v1606_v13, %v389_v8 }
 0x245   :  { %v1342_v51 = vpop.eup %1341  ;;  %1198 = vst [vmem:[%s2242_s7 + $0x160] sm:$0xff] %v1340_v26  ;;  %v415_v52 = vmax.f32 %v413_v58, 0.0  ;;  %v448_v53 = vadd.f32 %v446_v4, %v1610_v15  ;;  %v472_v12 = vmul.f32 %v1612_v16, %v389_v8  ;;  %v478_v55 = vmul.f32 %v1608_v14, %v398_v57 }
 0x246   :  { %v1344_v59 = vpop.eup %1343  ;;  %1196 = vst [vmem:[%s2242_s7 + $0x150] sm:$0xff] %v1342_v51  ;;  %v429_v39 = vadd.f32 %v427_v44, %v422_v48  ;;  %v441_v62 = vmax.f32 %v439_v56, 0.0  ;;  %v465_v9 = vadd.f32 %v463_v50, %v1610_v15  ;;  %v489_v49 = vmul.f32 %v1606_v13, %v398_v57 }
 0x247   :  { %v1346_v2 = vpop.eup %1345  ;;  %1202 = vst [vmem:[%s2242_s7 + $0x180] sm:$0xff] %v1344_v59  ;;  %v454_v3 = vadd.f32 %v452_v43, %v448_v53  ;;  %v474_v47 = vadd.f32 %v472_v12, %v1610_v15  ;;  %v498_v14 = vmul.f32 %v1612_v16, %v398_v57  ;;  %v514_v5 = vmul.f32 %v1614_v21, %v415_v52 }
 0x248   :  { %v1348_v6 = vpop.eup %1347  ;;  %1200 = vst [vmem:[%s2242_s7 + $0x170] sm:$0xff] %v1346_v2  ;;  %v431_v7 = vmax.f32 %v429_v39, 0.0  ;;  %v467_v10 = vmax.f32 %v465_v9, 0.0  ;;  %v491_v13 = vadd.f32 %v489_v49, %v1610_v15  ;;  %v524_v11 = vmul.f32 %v1622_v24, %v415_v52 }
 0x249   :  { %v1350_v33 = vpop.eup %1349  ;;  %1204 = vst [vmem:[%s2242_s7 + $0x190] sm:$0xff] %v1348_v6  ;;  %v456_v17 = vmax.f32 %v454_v3, 0.0  ;;  %v480_v16 = vadd.f32 %v478_v55, %v474_v47  ;;  %v500_v18 = vadd.f32 %v498_v14, %v1610_v15  ;;  %v1948_v63 = vadd.f32 %v1619_v23, %v514_v5 }
 0x24a   :  { %v1352_v19 = vpop.eup %1351  ;;  %1206 = vst [vmem:[%s2242_s7 + $0x1a0] sm:$0xff] %v1350_v33  ;;  %v493_v0 = vmax.f32 %v491_v13, 0.0  ;;  %v526_v27 = vadd.f32 %v524_v11, %v1619_v23  ;;  %v531_v20 = vmul.f32 %v1617_v22, %v431_v7  ;;  %v541_v25 = vmul.f32 %v1614_v21, %v431_v7 }
 0x24b   :  { %v1354_v28 = vpop.eup %1353  ;;  %1210 = vst [vmem:[%s2242_s7 + $0x1c0] sm:$0xff] %v1352_v19  ;;  %v482_v15 = vmax.f32 %v480_v16, 0.0  ;;  %v502_v34 = vmax.f32 %v500_v18, 0.0  ;;  %v519_v61 = vmax.f32 %v1948_v63, 0.0  ;;  %v549_v60 = vmul.f32 %v1622_v24, %v431_v7 }
 0x24c   :  { %v1356_v36 = vpop.eup %1355  ;;  %1208 = vst [vmem:[%s2242_s7 + $0x1b0] sm:$0xff] %v1354_v28  ;;  %v533_v35 = vadd.f32 %v531_v20, %v526_v27  ;;  %v543_v37 = vadd.f32 %v541_v25, %v1619_v23  ;;  %v555_v1 = vmul.f32 %v1617_v22, %v441_v62  ;;  %v565_v8 = vmul.f32 %v1614_v21, %v441_v62 }
 0x24d   :  { %v1358_v38 = vpop.eup %1357  ;;  %1214 = vst [vmem:[%s2242_s7 + $0x1e0] sm:$0xff] %v1356_v36  ;;  %v551_v40 = vadd.f32 %v549_v60, %v1619_v23  ;;  %v574_v57 = vmul.f32 %v1622_v24, %v441_v62  ;;  %v580_v41 = vmul.f32 %v1617_v22, %v456_v17  ;;  %v591_v42 = vmul.f32 %v1614_v21, %v456_v17 }
 0x24e   :  { %v1360_v54 = vpop.eup %1359  ;;  %1212 = vst [vmem:[%s2242_s7 + $0x1d0] sm:$0xff] %v1358_v38  ;;  %v535_v44 = vmax.f32 %v533_v35, 0.0  ;;  %v545_v45 = vmax.f32 %v543_v37, 0.0  ;;  %v567_v46 = vadd.f32 %v565_v8, %v1619_v23  ;;  %v600_v58 = vmul.f32 %v1622_v24, %v456_v17 }
 0x24f   :  { %1216 = vst [vmem:[%s2242_s7 + $0x1f0] sm:$0xff] %v1360_v54  ;;  %v557_v4 = vadd.f32 %v555_v1, %v551_v40  ;;  %v576_v43 = vadd.f32 %v574_v57, %v1619_v23  ;;  %v593_v26 = vadd.f32 %v591_v42, %v1619_v23  ;;  %v606_v48 = vmul.f32 %v1617_v22, %v467_v10 }
 0x250   :  { %v1985_v56 = vmax.f32 %v567_v46, 0.0  ;;  %v602_v50 = vadd.f32 %v600_v58, %v1619_v23  ;;  %v617_v51 = vmul.f32 %v1614_v21, %v467_v10  ;;  %v626_v52 = vmul.f32 %v1622_v24, %v467_v10 }
 0x251   :  { %v559_v53 = vmax.f32 %v557_v4, 0.0  ;;  %v582_v12 = vadd.f32 %v580_v41, %v576_v43  ;;  %v1990_v55 = vmax.f32 %v593_v26, 0.0  ;;  %v632_v59 = vmul.f32 %v1617_v22, %v482_v15 }
 0x252   :  { %v608_v39 = vadd.f32 %v606_v48, %v602_v50  ;;  %v619_v62 = vadd.f32 %v617_v51, %v1619_v23  ;;  %v628_v9 = vadd.f32 %v626_v52, %v1619_v23  ;;  %v643_v49 = vmul.f32 %v1614_v21, %v482_v15 }
 0x253   :  { %v584_v2 = vmax.f32 %v582_v12, 0.0  ;;  %v652_v3 = vmul.f32 %v1622_v24, %v482_v15  ;;  %v658_v47 = vmul.f32 %v1617_v22, %v493_v0  ;;  %v669_v14 = vmul.f32 %v1614_v21, %v493_v0 }
 0x254   :  { %v1999_v5 = vmax.f32 %v608_v39, 0.0  ;;  %v2001_v6 = vmax.f32 %v619_v62, 0.0  ;;  %v634_v7 = vadd.f32 %v632_v59, %v628_v9  ;;  %v645_v10 = vadd.f32 %v643_v49, %v1619_v23 }
 0x255   :  { %v654_v13 = vadd.f32 %v652_v3, %v1619_v23  ;;  %v671_v11 = vadd.f32 %v669_v14, %v1619_v23  ;;  %v678_v33 = vmul.f32 %v1622_v24, %v493_v0  ;;  %v684_v17 = vmul.f32 %v1617_v22, %v502_v34 }
 0x256   :  { %v2008_v16 = vmax.f32 %v634_v7, 0.0  ;;  %v2010_v18 = vmax.f32 %v645_v10, 0.0  ;;  %v695_v63 = vmul.f32 %v1614_v21, %v502_v34  ;;  %v704_v19 = vmul.f32 %v1622_v24, %v502_v34 }
 0x257   :  { %v660_v27 = vadd.f32 %v658_v47, %v654_v13  ;;  %v2014_v20 = vmax.f32 %v671_v11, 0.0  ;;  %v680_v25 = vadd.f32 %v678_v33, %v1619_v23  ;;  %v720_v28 = vmul.f32 %v1625_v29, %v519_v61 }
 0x258   :  { %v697_v15 = vadd.f32 %v695_v63, %v1619_v23  ;;  %v706_v0 = vadd.f32 %v704_v19, %v1619_v23  ;;  %v730_v22 = vmul.f32 %v1633_v32, %v519_v61  ;;  %v737_v60 = vmul.f32 %v1628_v30, %v535_v44 }
 0x259   :  { %v2022_v36 = vmax.f32 %v660_v27, 0.0  ;;  %v686_v21 = vadd.f32 %v684_v17, %v680_v25  ;;  %v723_v24 = vadd.f32 %v1630_v31, %v720_v28  ;;  %v748_v34 = vmul.f32 %v1625_v29, %v535_v44 }
 0x25a   :  { %v2026_v35 = vmax.f32 %v697_v15, 0.0  ;;  %v2028_v37 = vmax.f32 %v706_v0, 0.0  ;;  %v732_v1 = vadd.f32 %v730_v22, %v1630_v31  ;;  %v757_v8 = vmul.f32 %v1633_v32, %v535_v44 }
 0x25b   :  { %v2032_v23 = vmax.f32 %v686_v21, 0.0  ;;  %1361 = vtanh.f32 %v723_v24  ;;  %v750_v61 = vadd.f32 %v748_v34, %v1630_v31  ;;  %v763_v38 = vmul.f32 %v1628_v30, %v545_v45 }
 0x25c   :  { %v739_v40 = vadd.f32 %v737_v60, %v732_v1  ;;  %v759_v57 = vadd.f32 %v757_v8, %v1630_v31  ;;  %v774_v41 = vmul.f32 %v1625_v29, %v545_v45  ;;  %v783_v42 = vmul.f32 %v1633_v32, %v545_v45 }
 0x25d   :  { %1363 = vtanh.f32 %v750_v61  ;;  %v789_v54 = vmul.f32 %v1628_v30, %v559_v53  ;;  %v800_v46 = vmul.f32 %v1625_v29, %v559_v53  ;;  %v809_v44 = vmul.f32 %v1633_v32, %v559_v53 }
 0x25e   :  { %1365 = vtanh.f32 %v739_v40  ;;  %v765_v58 = vadd.f32 %v763_v38, %v759_v57  ;;  %v776_v4 = vadd.f32 %v774_v41, %v1630_v31  ;;  %v785_v43 = vadd.f32 %v783_v42, %v1630_v31 }
 0x25f   :  { %v802_v26 = vadd.f32 %v800_v46, %v1630_v31  ;;  %v811_v48 = vadd.f32 %v809_v44, %v1630_v31  ;;  %v815_v45 = vmul.f32 %v1628_v30, %v1985_v56  ;;  %v826_v50 = vmul.f32 %v1625_v29, %v1985_v56 }
 0x260   :  { %1367 = vtanh.f32 %v765_v58  ;;  %v791_v51 = vadd.f32 %v789_v54, %v785_v43  ;;  %v835_v52 = vmul.f32 %v1633_v32, %v1985_v56  ;;  %v841_v53 = vmul.f32 %v1628_v30, %v584_v2 }
 0x261   :  { %1369 = vtanh.f32 %v776_v4  ;;  %v817_v12 = vadd.f32 %v815_v45, %v811_v48  ;;  %v828_v59 = vadd.f32 %v826_v50, %v1630_v31  ;;  %v852_v39 = vmul.f32 %v1625_v29, %v584_v2 }
 0x262   :  { %1371 = vtanh.f32 %v791_v51  ;;  %v837_v62 = vadd.f32 %v835_v52, %v1630_v31  ;;  %v861_v9 = vmul.f32 %v1633_v32, %v584_v2  ;;  %v867_v49 = vmul.f32 %v1628_v30, %v1990_v55 }
 0x263   :  { %1373 = vtanh.f32 %v802_v26  ;;  %v854_v3 = vadd.f32 %v852_v39, %v1630_v31  ;;  %v878_v56 = vmul.f32 %v1625_v29, %v1990_v55  ;;  %v887_v47 = vmul.f32 %v1633_v32, %v1990_v55 }
 0x264   :  { %1375 = vtanh.f32 %v817_v12  ;;  %v843_v14 = vadd.f32 %v841_v53, %v837_v62  ;;  %v863_v7 = vadd.f32 %v861_v9, %v1630_v31  ;;  %v893_v10 = vmul.f32 %v1628_v30, %v1999_v5 }
 0x265   :  { %v1362_v2 = vpop.eup %1361  ;;  %1377 = vtanh.f32 %v828_v59  ;;  %v880_v13 = vadd.f32 %v878_v56, %v1630_v31  ;;  %v889_v11 = vadd.f32 %v887_v47, %v1630_v31  ;;  %v904_v33 = vmul.f32 %v1625_v29, %v1999_v5 }
 0x266   :  { %727 = vst [vmem:[%s2242_s7 + $0x8] sm:$0xff] %v1362_v2  ;;  %1379 = vtanh.f32 %v843_v14  ;;  %v869_v55 = vadd.f32 %v867_v49, %v863_v7  ;;  %v913_v17 = vmul.f32 %v1633_v32, %v1999_v5  ;;  %v919_v63 = vmul.f32 %v1628_v30, %v2001_v6 }
 0x267   :  { %v1364_v19 = vpop.eup %1363  ;;  %1381 = vtanh.f32 %v854_v3  ;;  %v895_v27 = vadd.f32 %v893_v10, %v889_v11  ;;  %v906_v25 = vadd.f32 %v904_v33, %v1630_v31  ;;  %v930_v28 = vmul.f32 %v1625_v29, %v2001_v6 }
 0x268   :  { %v1366_v15 = vpop.eup %1365  ;;  %1159 = vst [vmem:[%s2242_s7 + $0x28] sm:$0xff] %v1364_v19  ;;  %1383 = vtanh.f32 %v869_v55  ;;  %v915_v0 = vadd.f32 %v913_v17, %v1630_v31  ;;  %v939_v5 = vmul.f32 %v1633_v32, %v2001_v6  ;;  %v945_v22 = vmul.f32 %v1628_v30, %v2008_v16 }
 0x269   :  { %1157 = vst [vmem:[%s2242_s7 + $0x18] sm:$0xff] %v1366_v15  ;;  %1385 = vtanh.f32 %v880_v13  ;;  %v932_v60 = vadd.f32 %v930_v28, %v1630_v31  ;;  %v956_v21 = vmul.f32 %v1625_v29, %v2008_v16  ;;  %v965_v24 = vmul.f32 %v1633_v32, %v2008_v16 }
 0x26a   :  { %v1368_v34 = vpop.eup %1367  ;;  %1387 = vtanh.f32 %v895_v27  ;;  %v921_v1 = vadd.f32 %v919_v63, %v915_v0  ;;  %v941_v6 = vadd.f32 %v939_v5, %v1630_v31  ;;  %v971_v8 = vmul.f32 %v1628_v30, %v2010_v18 }
 0x26b   :  { %v1370_v61 = vpop.eup %1369  ;;  %1161 = vst [vmem:[%s2242_s7 + $0x38] sm:$0xff] %v1368_v34  ;;  %1389 = vtanh.f32 %v906_v25  ;;  %v958_v38 = vadd.f32 %v956_v21, %v1630_v31  ;;  %v967_v40 = vadd.f32 %v965_v24, %v1630_v31  ;;  %v982_v16 = vmul.f32 %v1625_v29, %v2010_v18 }
 0x26c   :  { %v1372_v57 = vpop.eup %1371  ;;  %1163 = vst [vmem:[%s2242_s7 + $0x48] sm:$0xff] %v1370_v61  ;;  %1391 = vtanh.f32 %v921_v1  ;;  %v947_v41 = vadd.f32 %v945_v22, %v941_v6  ;;  %v991_v42 = vmul.f32 %v1633_v32, %v2010_v18  ;;  %v997_v54 = vmul.f32 %v1628_v30, %v2022_v36 }
 0x26d   :  { %v1374_v46 = vpop.eup %1373  ;;  %1165 = vst [vmem:[%s2242_s7 + $0x58] sm:$0xff] %v1372_v57  ;;  %1393 = vtanh.f32 %v932_v60  ;;  %v973_v44 = vadd.f32 %v971_v8, %v967_v40  ;;  %v984_v58 = vadd.f32 %v982_v16, %v1630_v31  ;;  %v1008_v4 = vmul.f32 %v1625_v29, %v2022_v36 }
 0x26e   :  { %v1376_v43 = vpop.eup %1375  ;;  %1167 = vst [vmem:[%s2242_s7 + $0x68] sm:$0xff] %v1374_v46  ;;  %1395 = vtanh.f32 %v947_v41  ;;  %v993_v18 = vadd.f32 %v991_v42, %v1630_v31  ;;  %v1017_v26 = vmul.f32 %v1633_v32, %v2022_v36  ;;  %v1023_v48 = vmul.f32 %v1628_v30, %v2014_v20 }
 0x26f   :  { %v1378_v45 = vpop.eup %1377  ;;  %1169 = vst [vmem:[%s2242_s7 + $0x78] sm:$0xff] %v1376_v43  ;;  %1397 = vtanh.f32 %v958_v38  ;;  %v1010_v50 = vadd.f32 %v1008_v4, %v1630_v31  ;;  %v1034_v51 = vmul.f32 %v1625_v29, %v2014_v20  ;;  %v1043_v52 = vmul.f32 %v1633_v32, %v2014_v20 }
 0x270   :  { %v1380_v53 = vpop.eup %1379  ;;  %1171 = vst [vmem:[%s2242_s7 + $0x88] sm:$0xff] %v1378_v45  ;;  %1399 = vtanh.f32 %v973_v44  ;;  %v999_v36 = vadd.f32 %v997_v54, %v993_v18  ;;  %v1019_v12 = vadd.f32 %v1017_v26, %v1630_v31  ;;  %v1049_v59 = vmul.f32 %v1628_v30, %v2032_v23 }
 0x271   :  { %v1382_v39 = vpop.eup %1381  ;;  %1173 = vst [vmem:[%s2242_s7 + $0x98] sm:$0xff] %v1380_v53  ;;  %1401 = vtanh.f32 %v984_v58  ;;  %v1036_v20 = vadd.f32 %v1034_v51, %v1630_v31  ;;  %v1045_v62 = vadd.f32 %v1043_v52, %v1630_v31  ;;  %v1060_v9 = vmul.f32 %v1625_v29, %v2032_v23 }
 0x272   :  { %v1384_v49 = vpop.eup %1383  ;;  %1175 = vst [vmem:[%s2242_s7 + $0xa8] sm:$0xff] %v1382_v39  ;;  %1403 = vtanh.f32 %v999_v36  ;;  %v1025_v3 = vadd.f32 %v1023_v48, %v1019_v12  ;;  %v1069_v56 = vmul.f32 %v1633_v32, %v2032_v23  ;;  %v1086_v10 = vmul.f32 %v1625_v29, %v2026_v35 }
 0x273   :  { %v1386_v47 = vpop.eup %1385  ;;  %1177 = vst [vmem:[%s2242_s7 + $0xb8] sm:$0xff] %v1384_v49  ;;  %1405 = vtanh.f32 %v1010_v50  ;;  %v1051_v14 = vadd.f32 %v1049_v59, %v1045_v62  ;;  %v1062_v7 = vadd.f32 %v1060_v9, %v1630_v31  ;;  %v1075_v13 = vmul.f32 %v1628_v30, %v2026_v35 }
 0x274   :  { %v1388_v2 = vpop.eup %1387  ;;  %1179 = vst [vmem:[%s2242_s7 + $0xc8] sm:$0xff] %v1386_v47  ;;  %1407 = vtanh.f32 %v1025_v3  ;;  %v1071_v23 = vadd.f32 %v1069_v56, %v1630_v31  ;;  %v1095_v11 = vmul.f32 %v1633_v32, %v2026_v35  ;;  %v1088_v55 = vadd.f32 %v1086_v10, %v1630_v31 }
 0x275   :  { %v1390_v33 = vpop.eup %1389  ;;  %1181 = vst [vmem:[%s2242_s7 + $0xd8] sm:$0xff] %v1388_v2  ;;  %1409 = vtanh.f32 %v1036_v20  ;;  %v1112_v17 = vmul.f32 %v1625_v29, %v2028_v37  ;;  %v1121_v63 = vmul.f32 %v1633_v32, %v2028_v37  ;;  %v1101_v25 = vmul.f32 %v1628_v30, %v2028_v37 }
 0x276   :  { %v1392_v19 = vpop.eup %1391  ;;  %1183 = vst [vmem:[%s2242_s7 + $0xe8] sm:$0xff] %v1390_v33  ;;  %1411 = vtanh.f32 %v1051_v14  ;;  %v1077_v35 = vadd.f32 %v1075_v13, %v1071_v23  ;;  %v1097_v27 = vadd.f32 %v1095_v11, %v1630_v31 }
 0x277   :  { %v1394_v28 = vpop.eup %1393  ;;  %1185 = vst [vmem:[%s2242_s7 + $0xf8] sm:$0xff] %v1392_v19  ;;  %1413 = vtanh.f32 %v1062_v7  ;;  %v1114_v29 = vadd.f32 %v1112_v17, %v1630_v31  ;;  %v1123_v0 = vadd.f32 %v1121_v63, %v1630_v31 }
 0x278   :  { %v1396_v32 = vpop.eup %1395  ;;  %1187 = vst [vmem:[%s2242_s7 + $0x108] sm:$0xff] %v1394_v28  ;;  %1415 = vtanh.f32 %v1077_v35  ;;  %v1103_v15 = vadd.f32 %v1101_v25, %v1097_v27 }
 0x279   :  { %v1398_v5 = vpop.eup %1397  ;;  %1189 = vst [vmem:[%s2242_s7 + $0x118] sm:$0xff] %v1396_v32  ;;  %1417 = vtanh.f32 %v1088_v55 }
 0x27a   :  { %v1400_v30 = vpop.eup %1399  ;;  %1191 = vst [vmem:[%s2242_s7 + $0x128] sm:$0xff] %v1398_v5  ;;  %1419 = vtanh.f32 %v1103_v15 }
 0x27b   :  { %v1402_v37 = vpop.eup %1401  ;;  %1193 = vst [vmem:[%s2242_s7 + $0x138] sm:$0xff] %v1400_v30  ;;  %1421 = vtanh.f32 %v1114_v29 }
 0x27c   :  { %v1404_v22 = vpop.eup %1403  ;;  %1195 = vst [vmem:[%s2242_s7 + $0x148] sm:$0xff] %v1402_v37  ;;  %1423 = vtanh.f32 %v1123_v0 }
 0x27d   :  { %v1406_v31 = vpop.eup %1405  ;;  %1197 = vst [vmem:[%s2242_s7 + $0x158] sm:$0xff] %v1404_v22 }
 0x27e   :  { %v1408_v60 = vpop.eup %1407  ;;  %1199 = vst [vmem:[%s2242_s7 + $0x168] sm:$0xff] %v1406_v31 }
 0x27f   :  { %v1410_v21 = vpop.eup %1409  ;;  %1201 = vst [vmem:[%s2242_s7 + $0x178] sm:$0xff] %v1408_v60 }
 0x280   :  { %v1412_v24 = vpop.eup %1411  ;;  %1203 = vst [vmem:[%s2242_s7 + $0x188] sm:$0xff] %v1410_v21 }
 0x281   :  { %v1414_v34 = vpop.eup %1413  ;;  %1205 = vst [vmem:[%s2242_s7 + $0x198] sm:$0xff] %v1412_v24 }
 0x282   :  { %v1416_v1 = vpop.eup %1415  ;;  %1207 = vst [vmem:[%s2242_s7 + $0x1a8] sm:$0xff] %v1414_v34 }
 0x283   :  { %v1418_v6 = vpop.eup %1417  ;;  %1209 = vst [vmem:[%s2242_s7 + $0x1b8] sm:$0xff] %v1416_v1 }
 0x284   :  { %v1420_v8 = vpop.eup %1419  ;;  %1211 = vst [vmem:[%s2242_s7 + $0x1c8] sm:$0xff] %v1418_v6 }
 0x285   :  { %v1422_v61 = vpop.eup %1421  ;;  %1213 = vst [vmem:[%s2242_s7 + $0x1d8] sm:$0xff] %v1420_v8 }
 0x286   :  { %v1424_v38 = vpop.eup %1423  ;;  %1215 = vst [vmem:[%s2242_s7 + $0x1e8] sm:$0xff] %v1422_v61 }
 0x287   :  { %1217 = vst [vmem:[%s2242_s7 + $0x1f8] sm:$0xff] %v1424_v38 }
 0x288   :  { %1133 = vsyncpa [#allocation5], 1 }
 0x289   :  { %1134 = vsyncpa [#allocation8], 1 }
 0x28a   :  { %1135 = vsyncpa [#allocation6], 1 }
 0x28b   :  { %1136 = vsyncpa [#allocation11], 1 }

</bundles_post_ra>
